<compile_context>
chip_gen: v6e
topology: v6e:2x2x1
jax: 0.10.0
libtpu: 0.0.40
codegen_flags: <defaults>
</compile_context>

<pallas_src>
import jax
import jax.numpy as jnp
from jax import lax
from jax.experimental import pallas as pl
from jax.experimental.pallas import tpu as pltpu


_OUT_LANES = 128                     # lane-dense per-row-loss output width
_VMEM_BUDGET = 40 * 1024 * 1024      # target live VMEM (fits v7x 64 MiB parts)
_VMEM_LIMIT = 48 * 1024 * 1024       # explicit scoped-VMEM limit for Mosaic


def _round_up(x, m):
    return ((x + m - 1) // m) * m


def _pick_row_tile(na, nc_pad, d_pad, feat_bytes, mask_in_hbm):
    """Largest row tile (multiple of 128, <= 512) whose footprint fits budget."""
    tm = min(512, _round_up(max(na, 1), 128))
    while tm > 128:
        est = (
            2 * tm * d_pad * feat_bytes          # anchor tile (double-buffered)
            + 2 * nc_pad * d_pad * feat_bytes    # resident contrast features
            + (2 * tm * nc_pad * 4 if mask_in_hbm else 2 * nc_pad * 4)
            + 6 * tm * nc_pad * 4                # f32 temporaries (logits, exp, ...)
            + 2 * tm * _OUT_LANES * 4            # output tile
        )
        if est <= _VMEM_BUDGET:
            break
        tm //= 2
    return max(tm, 128)


def _make_supcon_kernel(*, use_labels, tm, nc_pad, nc, inv_temp, loss_scale):
    """All closure values are Python ints/floats (no captured JAX constants)."""

    def _logits_and_masks(a_ref, c_ref):
        # [TM, Nc_pad] = [TM, D] @ [Nc_pad, D]^T, contraction on the lane axis of
        # both operands (no explicit transpose), f32 accumulation on the MXU.
        logits = lax.dot_general(
            a_ref[...], c_ref[...],
            dimension_numbers=(((1,), (1,)), ((), ())),
            precision=lax.Precision.HIGHEST,
            preferred_element_type=jnp.float32,
        ) * inv_temp

        row0 = pl.program_id(0) * tm
        row_g = row0 + lax.broadcasted_iota(jnp.int32, (tm, 1), 0)   # [TM, 1]
        col = lax.broadcasted_iota(jnp.int32, (1, nc_pad), 1)        # [1, Nc_pad]
        col_valid = col < nc                                         # padded cols
        not_diag = col != row_g                                      # self-contrast
        # Push padded columns to -1e30 so they vanish from max / exp (kept finite
        # so mask * log_prob never produces 0 * inf = NaN).
        logits = jnp.where(col_valid, logits, -1e30)
        return logits, not_diag, col_valid

    def _finish(pos_f32, logits, not_diag, out_ref):
        logits = logits - jnp.max(logits, axis=1, keepdims=True)
        exp_logits = jnp.where(not_diag, jnp.exp(logits), 0.0)
        log_prob = logits - jnp.log(jnp.sum(exp_logits, axis=1, keepdims=True))

        pos_sum = jnp.sum(pos_f32 * log_prob, axis=1, keepdims=True)   # [TM, 1]
        pos_cnt = jnp.sum(pos_f32, axis=1, keepdims=True)              # [TM, 1]
        # Guard anchors with no positives (PyTorch would emit NaN here).
        mean_pos = jnp.where(pos_cnt > 0.0,
                             pos_sum / jnp.maximum(pos_cnt, 1.0), 0.0)
        loss_rows = (-loss_scale) * mean_pos                           # [TM, 1]
        out_ref[...] = jnp.broadcast_to(
            loss_rows, (tm, _OUT_LANES)).astype(out_ref.dtype)

    if use_labels:
        def kernel(alab_ref, clab_ref, a_ref, c_ref, out_ref):
            logits, not_diag, col_valid = _logits_and_masks(a_ref, c_ref)
            eq = alab_ref[...] == clab_ref[...]                        # [TM, Nc_pad]
            pos = jnp.logical_and(jnp.logical_and(eq, not_diag), col_valid)
            _finish(pos.astype(jnp.float32), logits, not_diag, out_ref)
    else:
        def kernel(mask_ref, a_ref, c_ref, out_ref):
            logits, not_diag, _ = _logits_and_masks(a_ref, c_ref)
            pos = mask_ref[...] * not_diag.astype(jnp.float32)
            _finish(pos, logits, not_diag, out_ref)

    return kernel


def supcon_loss(features, labels=None, mask=None, *, temperature=0.07,
                contrast_mode="all", base_temperature=0.07):
    """JAX/Pallas equivalent of SupConLoss.forward (returns a scalar loss)."""
    if features.ndim < 3:
        raise ValueError("`features` needs to be [bsz, n_views, ...]")
    bsz, n_views = features.shape[0], features.shape[1]
    features = features.reshape(bsz, n_views, -1)            # keep input dtype
    d = features.shape[-1]

    if labels is not None and mask is not None:
        raise ValueError("Cannot define both `labels` and `mask`")

    # contrast_feature = cat(unbind(features, dim=1), dim=0) -> [n_views*bsz, D]
    contrast_feature = jnp.transpose(features, (1, 0, 2)).reshape(n_views * bsz, d)
    if contrast_mode == "one":
        anchor_feature, anchor_count = features[:, 0, :], 1
    elif contrast_mode == "all":
        anchor_feature, anchor_count = contrast_feature, n_views
    else:
        raise ValueError(f"Unknown mode: {contrast_mode}")

    na = anchor_count * bsz
    nc = n_views * bsz

    use_labels = mask is None
    if use_labels:
        if labels is None:
            # eye-mask (SimCLR) case == "every sample is its own class"
            labels = jnp.arange(bsz, dtype=jnp.int32)
        labels = labels.reshape(-1).astype(jnp.int32)
        if labels.shape[0] != bsz:
            raise ValueError("Num of labels does not match num of features")

    # TPU-friendly padded geometry.
    d_pad = _round_up(d, 128)
    nc_pad = _round_up(nc, 128)
    feat_bytes = features.dtype.itemsize
    tm = _pick_row_tile(na, nc_pad, d_pad, feat_bytes, mask_in_hbm=not use_labels)
    na_pad = _round_up(na, tm)

    anchor_p = jnp.pad(anchor_feature, ((0, na_pad - na), (0, d_pad - d)))
    contrast_p = jnp.pad(contrast_feature, ((0, nc_pad - nc), (0, d_pad - d)))

    kernel = _make_supcon_kernel(
        use_labels=use_labels, tm=tm, nc_pad=nc_pad, nc=nc,
        inv_temp=float(1.0 / temperature),
        loss_scale=float(temperature / base_temperature))

    if use_labels:
        anchor_labels = jnp.tile(labels, anchor_count)                 # [Na]
        contrast_labels = jnp.tile(labels, n_views)                    # [Nc]
        alab = jnp.pad(anchor_labels, (0, na_pad - na),
                       constant_values=-1).reshape(na_pad, 1)
        clab = jnp.pad(contrast_labels, (0, nc_pad - nc),
                       constant_values=-1).reshape(1, nc_pad)
        in_specs = [
            pl.BlockSpec((tm, 1), lambda i: (i, 0)),              # anchor labels
            pl.BlockSpec((1, nc_pad), lambda i: (0, 0)),          # contrast labels
            pl.BlockSpec((tm, d_pad), lambda i: (i, 0)),          # anchor tile
            pl.BlockSpec((nc_pad, d_pad), lambda i: (0, 0)),      # contrast (resident)
        ]
        args = (alab, clab, anchor_p, contrast_p)
    else:
        # Explicit (possibly asymmetric) user mask: fall back to shipping the
        # tiled mask, still row-tiled/pipelined.
        base_mask = mask.astype(jnp.float32)
        mask_tiled = jnp.tile(base_mask, (anchor_count, n_views))
        mask_p = jnp.pad(mask_tiled, ((0, na_pad - na), (0, nc_pad - nc)))
        in_specs = [
            pl.BlockSpec((tm, nc_pad), lambda i: (i, 0)),         # positive-mask tile
            pl.BlockSpec((tm, d_pad), lambda i: (i, 0)),          # anchor tile
            pl.BlockSpec((nc_pad, d_pad), lambda i: (0, 0)),      # contrast (resident)
        ]
        args = (mask_p, anchor_p, contrast_p)

    per_row = pl.pallas_call(
        kernel,
        out_shape=jax.ShapeDtypeStruct((na_pad, _OUT_LANES), jnp.float32),
        grid_spec=pltpu.PrefetchScalarGridSpec(
            num_scalar_prefetch=0,
            grid=(na_pad // tm,),
            in_specs=in_specs,
            out_specs=pl.BlockSpec((tm, _OUT_LANES), lambda i: (i, 0)),
        ),
        compiler_params=pltpu.CompilerParams(
            dimension_semantics=("parallel",),
            vmem_limit_bytes=_VMEM_LIMIT),
    )(*args)

    # loss.view(anchor_count, bsz).mean() == mean over all Na anchor rows.
    return jnp.mean(per_row[:na, 0])


def _supcon_loss_ref(features, labels=None, mask=None, *, temperature=0.07,
                     contrast_mode="all", base_temperature=0.07):
    """Pure-JAX reference mirroring the PyTorch code (for validation)."""
    bsz, n_views = features.shape[0], features.shape[1]
    features = features.reshape(bsz, n_views, -1).astype(jnp.float32)
    if labels is None and mask is None:
        base_mask = jnp.eye(bsz, dtype=jnp.float32)
    elif labels is not None:
        labels = labels.reshape(-1, 1)
        base_mask = (labels == labels.T).astype(jnp.float32)
    else:
        base_mask = mask.astype(jnp.float32)
    contrast_feature = jnp.concatenate(
        [features[:, v, :] for v in range(n_views)], axis=0)
    if contrast_mode == "one":
        anchor_feature, anchor_count = features[:, 0, :], 1
    else:
        anchor_feature, anchor_count = contrast_feature, n_views
    logits = jnp.matmul(anchor_feature, contrast_feature.T,
                        precision=lax.Precision.HIGHEST) / temperature
    logits = logits - jnp.max(logits, axis=1, keepdims=True)
    m = jnp.tile(base_mask, (anchor_count, n_views))
    na, nc = m.shape
    logits_mask = 1.0 - jnp.eye(na, nc, dtype=jnp.float32)
    m = m * logits_mask
    exp_logits = jnp.exp(logits) * logits_mask
    log_prob = logits - jnp.log(exp_logits.sum(1, keepdims=True))
    mean_log_prob_pos = (m * log_prob).sum(1) / m.sum(1)
    loss = -(temperature / base_temperature) * mean_log_prob_pos
    return loss.reshape(anchor_count, bsz).mean()


if __name__ == "__main__":
    key = jax.random.PRNGKey(0)
    k_feat, k_lab = jax.random.split(key)

    bsz, n_views, D = 8, 2, 32
    features = jax.random.normal(k_feat, (bsz, n_views, D), dtype=jnp.float32)
    # L2-normalize features as is conventional for SupCon inputs
    features = features / jnp.linalg.norm(features, axis=-1, keepdims=True)
    labels = jax.random.randint(k_lab, (bsz,), 0, 3)

    checks = []
    # labels-based mask path (mask built in-kernel from labels)
    checks.append((supcon_loss(features, labels=labels),
                   _supcon_loss_ref(features, labels=labels)))
    # default (eye mask / SimCLR) path
    checks.append((supcon_loss(features), _supcon_loss_ref(features)))
    # explicit-mask fallback path
    base_mask = (labels.reshape(-1, 1) == labels.reshape(1, -1)).astype(jnp.float32)
    checks.append((supcon_loss(features, mask=base_mask),
                   _supcon_loss_ref(features, mask=base_mask)))
    # contrast_mode='one'
    checks.append((supcon_loss(features, labels=labels, contrast_mode="one"),
                   _supcon_loss_ref(features, labels=labels, contrast_mode="one")))

    for got, want in checks:
        got = jax.block_until_ready(got)
        assert jnp.allclose(got, want, rtol=1e-4, atol=1e-4), (got, want)
    print("KERNEL_OK")
</pallas_src>

<mosaic_0001>
module attributes {stable_mosaic.version = 11 : i64} {
  func.func @kernel(%arg0: i32, %arg1: memref<128x1xi32, #tpu.memory_space<vmem>>, %arg2: memref<1x128xi32, #tpu.memory_space<vmem>>, %arg3: memref<128x128xf32, #tpu.memory_space<vmem>>, %arg4: memref<128x128xf32, #tpu.memory_space<vmem>>, %arg5: memref<128x128xf32, #tpu.memory_space<vmem>>) attributes {dimension_semantics = [#tpu.dimension_semantics<parallel>], iteration_bounds = array<i64: 1>, scalar_prefetch = 0 : i64, scratch_operands = 0 : i64, tpu.core_type = #tpu.core_type<tc>, window_params = [{transform_indices = @transform_0, window_bounds = array<i64: 128, 1>}, {pipeline_mode = #tpu.pipeline_mode<synchronous>, transform_indices = @transform_1, window_bounds = array<i64: 1, 128>}, {transform_indices = @transform_2, window_bounds = array<i64: 128, 128>}, {pipeline_mode = #tpu.pipeline_mode<synchronous>, transform_indices = @transform_3, window_bounds = array<i64: 128, 128>}, {transform_indices = @transform_4, window_bounds = array<i64: 128, 128>}]} {
    %c0 = arith.constant 0 : index
    %c0_0 = arith.constant 0 : index
    %0 = vector.load %arg3[%c0, %c0_0] : memref<128x128xf32, #tpu.memory_space<vmem>>, vector<128x128xf32>
    %c0_1 = arith.constant 0 : index
    %c0_2 = arith.constant 0 : index
    %1 = vector.load %arg4[%c0_1, %c0_2] : memref<128x128xf32, #tpu.memory_space<vmem>>, vector<128x128xf32>
    %cst = arith.constant dense<0.000000e+00> : vector<128x128xf32>
    %2 = tpu.matmul %0, %1, %cst {dimension_numbers = #tpu.dot_dimension_numbers<[1], [1], [0], [0], [0, 0, 1, 0], [], []>, precision = #tpu.contract_precision<fp32>} : vector<128x128xf32>, vector<128x128xf32>, vector<128x128xf32> -> vector<128x128xf32>
    %cst_3 = arith.constant 14.2857141 : f32
    %3 = vector.broadcast %cst_3 : f32 to vector<128x128xf32>
    %4 = arith.mulf %2, %3 : vector<128x128xf32>
    %c128_i32 = arith.constant 128 : i32
    %5 = arith.muli %arg0, %c128_i32 : i32
    %6 = tpu.iota {dimensions = array<i32: 0>} : vector<128x1xi32>
    %7 = vector.broadcast %5 : i32 to vector<128x1xi32>
    %8 = arith.addi %7, %6 : vector<128x1xi32>
    %9 = tpu.iota {dimensions = array<i32: 1>} : vector<1x128xi32>
    %c16_i32 = arith.constant 16 : i32
    %10 = vector.broadcast %c16_i32 : i32 to vector<1x128xi32>
    %11 = arith.cmpi slt, %9, %10 : vector<1x128xi32>
    %12 = vector.broadcast %9 : vector<1x128xi32> to vector<128x128xi32>
    %13 = vector.broadcast %8 : vector<128x1xi32> to vector<128x128xi32>
    %14 = arith.cmpi ne, %12, %13 : vector<128x128xi32>
    %cst_4 = arith.constant -1.000000e+30 : f32
    %15 = vector.shape_cast %11 : vector<1x128xi1> to vector<1x128xi1>
    %16 = vector.broadcast %15 : vector<1x128xi1> to vector<128x128xi1>
    %17 = vector.broadcast %cst_4 : f32 to vector<128x128xf32>
    %18 = arith.select %16, %4, %17 : vector<128x128xi1>, vector<128x128xf32>
    %c0_5 = arith.constant 0 : index
    %c0_6 = arith.constant 0 : index
    %19 = vector.load %arg1[%c0_5, %c0_6] : memref<128x1xi32, #tpu.memory_space<vmem>>, vector<128x1xi32>
    %c0_7 = arith.constant 0 : index
    %c0_8 = arith.constant 0 : index
    %20 = vector.load %arg2[%c0_7, %c0_8] : memref<1x128xi32, #tpu.memory_space<vmem>>, vector<1x128xi32>
    %21 = vector.broadcast %19 : vector<128x1xi32> to vector<128x128xi32>
    %22 = vector.broadcast %20 : vector<1x128xi32> to vector<128x128xi32>
    %23 = arith.cmpi eq, %21, %22 : vector<128x128xi32>
    %24 = arith.andi %23, %14 : vector<128x128xi1>
    %25 = vector.broadcast %11 : vector<1x128xi1> to vector<128x128xi1>
    %26 = arith.andi %24, %25 : vector<128x128xi1>
    %27 = arith.extui %26 : vector<128x128xi1> to vector<128x128xi32>
    %28 = arith.sitofp %27 : vector<128x128xi32> to vector<128x128xf32>
    %cst_9 = arith.constant dense<0xFF800000> : vector<128xf32>
    %29 = vector.multi_reduction <maximumf>, %18, %cst_9 [1] : vector<128x128xf32> to vector<128xf32>
    %30 = vector.shape_cast %29 : vector<128xf32> to vector<128x1xf32>
    %31 = vector.broadcast %30 : vector<128x1xf32> to vector<128x128xf32>
    %32 = arith.subf %18, %31 : vector<128x128xf32>
    %33 = math.exp %32 : vector<128x128xf32>
    %cst_10 = arith.constant 0.000000e+00 : f32
    %34 = vector.broadcast %cst_10 : f32 to vector<128x128xf32>
    %35 = arith.select %14, %33, %34 : vector<128x128xi1>, vector<128x128xf32>
    %cst_11 = arith.constant dense<0.000000e+00> : vector<128xf32>
    %36 = vector.multi_reduction <add>, %35, %cst_11 [1] : vector<128x128xf32> to vector<128xf32>
    %37 = vector.shape_cast %36 : vector<128xf32> to vector<128x1xf32>
    %38 = math.log %37 : vector<128x1xf32>
    %39 = vector.broadcast %38 : vector<128x1xf32> to vector<128x128xf32>
    %40 = arith.subf %32, %39 : vector<128x128xf32>
    %41 = arith.mulf %28, %40 : vector<128x128xf32>
    %cst_12 = arith.constant dense<0.000000e+00> : vector<128xf32>
    %42 = vector.multi_reduction <add>, %41, %cst_12 [1] : vector<128x128xf32> to vector<128xf32>
    %43 = vector.shape_cast %42 : vector<128xf32> to vector<128x1xf32>
    %cst_13 = arith.constant dense<0.000000e+00> : vector<128xf32>
    %44 = vector.multi_reduction <add>, %28, %cst_13 [1] : vector<128x128xf32> to vector<128xf32>
    %45 = vector.shape_cast %44 : vector<128xf32> to vector<128x1xf32>
    %cst_14 = arith.constant 0.000000e+00 : f32
    %46 = vector.broadcast %cst_14 : f32 to vector<128x1xf32>
    %47 = arith.cmpf ogt, %45, %46 : vector<128x1xf32>
    %cst_15 = arith.constant 1.000000e+00 : f32
    %48 = vector.broadcast %cst_15 : f32 to vector<128x1xf32>
    %49 = arith.maximumf %45, %48 : vector<128x1xf32>
    %50 = arith.divf %43, %49 : vector<128x1xf32>
    %cst_16 = arith.constant 0.000000e+00 : f32
    %51 = vector.broadcast %cst_16 : f32 to vector<128x1xf32>
    %52 = arith.select %47, %50, %51 : vector<128x1xi1>, vector<128x1xf32>
    %cst_17 = arith.constant -1.000000e+00 : f32
    %53 = vector.broadcast %cst_17 : f32 to vector<128x1xf32>
    %54 = arith.mulf %53, %52 : vector<128x1xf32>
    %55 = vector.shape_cast %54 : vector<128x1xf32> to vector<128x1xf32>
    %56 = vector.broadcast %55 : vector<128x1xf32> to vector<128x128xf32>
    %c0_18 = arith.constant 0 : index
    %c0_19 = arith.constant 0 : index
    %57 = vector.load %arg5[%c0_18, %c0_19] : memref<128x128xf32, #tpu.memory_space<vmem>>, vector<128x128xf32>
    tpu.vector_store %arg5[%c0_18, %c0_19], %56 {strides = array<i32>} : memref<128x128xf32, #tpu.memory_space<vmem>>, vector<128x128xf32>,
    return
  }
  func.func @transform_0(%arg0: i32) -> (i32, i32) {
    %c0_i32 = arith.constant 0 : i32
    %c0_i32_0 = arith.constant 0 : i32
    return %arg0, %c0_i32 : i32, i32
  }
  func.func @transform_1(%arg0: i32) -> (i32, i32) {
    %c0_i32 = arith.constant 0 : i32
    %c0_i32_0 = arith.constant 0 : i32
    %c0_i32_1 = arith.constant 0 : i32
    return %c0_i32, %c0_i32_0 : i32, i32
  }
  func.func @transform_2(%arg0: i32) -> (i32, i32) {
    %c0_i32 = arith.constant 0 : i32
    %c0_i32_0 = arith.constant 0 : i32
    return %arg0, %c0_i32 : i32, i32
  }
  func.func @transform_3(%arg0: i32) -> (i32, i32) {
    %c0_i32 = arith.constant 0 : i32
    %c0_i32_0 = arith.constant 0 : i32
    %c0_i32_1 = arith.constant 0 : i32
    return %c0_i32, %c0_i32_0 : i32, i32
  }
  func.func @transform_4(%arg0: i32) -> (i32, i32) {
    %c0_i32 = arith.constant 0 : i32
    %c0_i32_0 = arith.constant 0 : i32
    return %arg0, %c0_i32 : i32, i32
  }
}

</mosaic_0001>

<bundles_post_ra>
// kernel: tpu_custom_call.1
= control target key start
LH: loop header
LB: loop body
LE: loop exit
PB: predicated region body
PF: predicated region fallthrough
CT: control target
= control target key end

     0   :  { %9 = vsyncpa [#allocation3], 0  ;;  %s4058_s0 = inlined_call_operand.vmem [shape: s32[128,1], index: 0, kind: input, shape index: {}]   ;;  %s4059_s1 = inlined_call_operand.vmem [shape: s32[1,128], index: 1, kind: input, shape index: {}]   ;;  %s4060_s2 = inlined_call_operand.vmem [shape: f32[128,128], index: 2, kind: input, shape index: {}]   ;;  %s4061_s3 = inlined_call_operand.hbm [shape: f32[128,128], index: 3, kind: input, shape index: {}]   ;;  %s4062_s4 = inlined_call_operand.hbm [shape: f32[128,128], index: 4, kind: output, shape index: {}]  }
   0x1   :  { %10 = vsyncpa [#allocation4], 0  ;;  %s2665_s15 = smov [#allocation2]  }
   0x2   :  { %s22_s16 = sshll.u32 %s2665_s15, 4  ;;  %s23_s16 = int_to_ptr.vmem [resolvable:$true] %s22_s16 }
   0x3   :  { %s2629_s17 = scalar_lea.vmem %s23_s16, 2048  ;;  %p2634_p1 = scmp.lt.s32.totalorder %s23_s16, %s23_s16 }
   0x4   :  { %p2630_p0 = scmp.ne.s32.totalorder %s23_s16, %s2629_s17  ;;  %p2635_p2 = scmp.lt.s32.totalorder %s2629_s17, %s2629_s17 }
   0x6   :  { %p2636_p3 = por %p2635_p2, %p2634_p1 }
   0x8   :  { %p2637_p4 = pnand %p2636_p3, %p2630_p0 }
   0xa   :  { %2640 = shalt.err (!%p2637_p4)
}
   0xb   :  { %s2666_s18 = smov 128   ;;  %s2667_s19 = smov 8  }
   0xc   :  { %28 = dma.hbm_to_vmem [thread:$0]  %s4061_s3, 2048, %s23_s16, [#allocation3], %s2666_s18, %s2666_s18, %s2667_s19  }
   0xd   :  { %2661 = dma.done.wait [#allocation3], 2048  }
   0xe   :  { %2662 = vsyncadd [#allocation3], 4294965248  ;;  %v63_v0 = vld [vmem:[#allocation2 + $0x78] sm:$0xff]  ;;  %v62_v1 = vld [vmem:[#allocation2 + $0x70] sm:$0xff] }
   0xf   :  { %v61_v2 = vld [vmem:[#allocation2 + $0x68] sm:$0xff]  ;;  %v2702_v3 = vand.u32 4294901760, %v63_v0  ;;  %v2704_v4 = vand.u32 4294901760, %v62_v1  ;;  %v60_v6 = vld [vmem:[#allocation2 + $0x60] sm:$0xff]  ;;  %v59_v7 = vld [vmem:[#allocation2 + $0x58] sm:$0xff] }
  0x10   :  { %v2706_v5 = vand.u32 4294901760, %v61_v2  ;;  %v2708_v8 = vand.u32 4294901760, %v60_v6  ;;  %v2721_v12 = vand.u32 4294901760, %v59_v7  ;;  %v58_v16 = vld [vmem:[#allocation2 + $0x50] sm:$0xff]  ;;  %v57_v26 = vld [vmem:[#allocation2 + $0x48] sm:$0xff]  ;;  %v56_v31 = vld [vmem:[#allocation2 + $0x40] sm:$0xff] }
  0x11   :  { %2181 = vmatprep.subr.mxu0 %v2702_v3  ;;  %v2712_v9 = vsub.f32 %v63_v0, %v2702_v3  ;;  %v2715_v10 = vsub.f32 %v62_v1, %v2704_v4  ;;  %v2741_v20 = vand.u32 4294901760, %v58_v16  ;;  %v2753_v27 = vand.u32 4294901760, %v57_v26  ;;  %v32_v33 = vld [vmem:[%s4060_s2] sm:$0xff]  ;;  %v55_v39 = vld [vmem:[#allocation2 + $0x38] sm:$0xff]  ;;  %v54_v47 = vld [vmem:[#allocation2 + $0x30] sm:$0xff] }
  0x12   :  { %v2718_v11 = vsub.f32 %v61_v2, %v2706_v5  ;;  %2182 = vmatpush3.xpose.msra.mxu0 %v2702_v3  ;;  %v2734_v17 = vsub.f32 %v60_v6, %v2708_v8  ;;  %v2744_v21 = vsub.f32 %v59_v7, %v2721_v12  ;;  %v2768_v34 = vand.u32 4294901760, %v56_v31  ;;  %v53_v55 = vld [vmem:[#allocation2 + $0x28] sm:$0xff]  ;;  %v52_v61 = vld [vmem:[#allocation2 + $0x20] sm:$0xff]  ;;  %v51_v6 = vld [vmem:[#allocation2 + $0x18] sm:$0xff] }
  0x13   :  { %2183 = vmatprep.subr.mxu0 %v2704_v4  ;;  %v2725_v13 = vand.u32 4294901760, %v2712_v9  ;;  %v2728_v14 = vand.u32 4294901760, %v2715_v10  ;;  %v2762_v32 = vsub.f32 %v58_v16, %v2741_v20  ;;  %v2770_v35 = vand.u32 4294901760, %v32_v33 }
  0x14   :  { %v2731_v15 = vand.u32 4294901760, %v2718_v11  ;;  %v2750_v25 = vand.u32 4294901760, %v2734_v17  ;;  %v2759_v30 = vand.u32 4294901760, %v2744_v21  ;;  %v2779_v40 = vsub.f32 %v57_v26, %v2753_v27 }
  0x15   :  { %4130 = vst [vmem:[#allocation8_spill] sm:$0xff] %v2725_v13  ;;  %4131 = vst [vmem:[#allocation9_spill] sm:$0xff] %v2728_v14  ;;  %v309_v18 = vsub.f32 %v2712_v9, %v2725_v13  ;;  %v316_v19 = vsub.f32 %v2715_v10, %v2728_v14  ;;  %v2776_v38 = vand.u32 4294901760, %v2762_v32  ;;  %v2782_v41 = vsub.f32 %v32_v33, %v2770_v35  ;;  %v49_v33 = vld [vmem:[#allocation2 + $0x8] sm:$0xff] }
  0x16   :  { %4132 = vst [vmem:[#allocation10_spill] sm:$0xff] %v2731_v15  ;;  %2184 = vmatpush3.xpose.msra.mxu0 %v2704_v4  ;;  %v323_v24 = vsub.f32 %v2718_v11, %v2731_v15  ;;  %4133 = vst [vmem:[#allocation11_spill] sm:$0xff] %v2750_v25  ;;  %v330_v29 = vsub.f32 %v2734_v17, %v2750_v25  ;;  %v337_v37 = vsub.f32 %v2744_v21, %v2759_v30 }
  0x17   :  { %2185 = vmatprep.subr.mxu0 %v2706_v5  ;;  %v310_v22 = vand.u32 4294901760, %v309_v18  ;;  %v317_v23 = vand.u32 4294901760, %v316_v19  ;;  %4134 = vst [vmem:[#allocation12_spill] sm:$0xff] %v2759_v30  ;;  %4135 = vst [vmem:[#allocation13_spill] sm:$0xff] %v2770_v35  ;;  %2269 = vmatprep.mubr.f32.mxu1 %v2770_v35  ;;  %v2786_v42 = vand.u32 4294901760, %v55_v39  ;;  %v4063_v43 = vand.u32 4294901760, %v2782_v41 }
  0x18   :  { %v324_v28 = vand.u32 4294901760, %v323_v24  ;;  %v331_v36 = vand.u32 4294901760, %v330_v29  ;;  %4136 = vst [vmem:[#allocation14_spill] sm:$0xff] %v2776_v38  ;;  %v338_v44 = vand.u32 4294901760, %v337_v37  ;;  %v344_v45 = vsub.f32 %v2762_v32, %v2776_v38 }
  0x19   :  { %2237 = vmatprep.subr.mxu1 %v310_v22  ;;  %v2793_v46 = vand.u32 4294901760, %v2779_v40  ;;  %v2796_v48 = vsub.f32 %v56_v31, %v2768_v34  ;;  %v148_v49 = vsub.f32 %v2782_v41, %v4063_v43  ;;  %v2802_v50 = vand.u32 4294901760, %v54_v47 }
  0x1a   :  { %2186 = vmatpush3.xpose.msra.mxu0 %v2706_v5  ;;  %2238 = vmatpush3.xpose.msra.mxu1 %v310_v22  ;;  %v345_v52 = vand.u32 4294901760, %v344_v45  ;;  %v2811_v56 = vsub.f32 %v55_v39, %v2786_v42  ;;  %v2814_v57 = vand.u32 4294901760, %v53_v55  ;;  %v2826_v63 = vand.u32 4294901760, %v52_v61  ;;  %v33_v39 = vld [vmem:[%s4060_s2 + $0x8] sm:$0xff] }
  0x1b   :  { %2187 = vmatprep.subr.mxu0 %v2708_v8  ;;  %2239 = vmatprep.subr.mxu1 %v317_v23  ;;  %4137 = vst [vmem:[#allocation15_spill] sm:$0xff] %v2793_v46  ;;  %v149_v51 = vand.u32 4294901760, %v148_v49  ;;  %v351_v53 = vsub.f32 %v2779_v40, %v2793_v46  ;;  %v2808_v54 = vand.u32 4294901760, %v2796_v48  ;;  %v2823_v62 = vsub.f32 %v54_v47, %v2802_v50  ;;  %v40_v46 = vld [vmem:[%s4060_s2 + $0x40] sm:$0xff] }
  0x1c   :  { %v2820_v60 = vand.u32 4294901760, %v2811_v56  ;;  %v2835_v7 = vsub.f32 %v53_v55, %v2814_v57  ;;  %v2838_v16 = vand.u32 4294901760, %v51_v6  ;;  %v2847_v24 = vsub.f32 %v52_v61, %v2826_v63 }
  0x1d   :  { %4138 = vst [vmem:[#allocation16_spill] sm:$0xff] %v2808_v54  ;;  %2213 = vmatprep.mubr.f32.mxu0 %v149_v51  ;;  %v352_v58 = vand.u32 4294901760, %v351_v53  ;;  %v358_v59 = vsub.f32 %v2796_v48, %v2808_v54  ;;  %v2832_v2 = vand.u32 4294901760, %v2823_v62  ;;  %v2862_v37 = vand.u32 4294901760, %v49_v33  ;;  %v48_v51 = vld [vmem:[#allocation2] sm:$0xff]  ;;  %v34_v53 = vld [vmem:[%s4060_s2 + $0x10] sm:$0xff] }
  0x1e   :  { %2188 = vmatpush3.xpose.msra.mxu0 %v2708_v8  ;;  %2240 = vmatpush3.xpose.msra.mxu1 %v317_v23  ;;  %4139 = vst [vmem:[#allocation17_spill] sm:$0xff] %v2820_v60  ;;  %v365_v1 = vsub.f32 %v2811_v56, %v2820_v60  ;;  %v2844_v22 = vand.u32 4294901760, %v2835_v7  ;;  %v50_v23 = vld [vmem:[#allocation2 + $0x10] sm:$0xff]  ;;  %v2856_v31 = vand.u32 4294901760, %v2847_v24  ;;  %v2978_v25 = vand.u32 4294901760, %v40_v46 }
  0x1f   :  { %2189 = vmatprep.subr.mxu0 %v2721_v12  ;;  %2241 = vmatprep.subr.mxu1 %v324_v28  ;;  %v359_v0 = vand.u32 4294901760, %v358_v59  ;;  %4140 = vst [vmem:[#allocation18_spill] sm:$0xff] %v2832_v2  ;;  %v372_v19 = vsub.f32 %v2823_v62, %v2832_v2  ;;  %v2850_v26 = vand.u32 4294901760, %v50_v23  ;;  %4144 = vst [vmem:[#allocation22_spill] sm:$0xff] %v2862_v37 }
  0x20   :  { %v366_v18 = vand.u32 4294901760, %v365_v1  ;;  %4141 = vst [vmem:[#allocation19_spill] sm:$0xff] %v2844_v22  ;;  %v379_v29 = vsub.f32 %v2835_v7, %v2844_v22  ;;  %4143 = vst [vmem:[#allocation21_spill] sm:$0xff] %v2856_v31  ;;  %v386_v45 = vsub.f32 %v2847_v24, %v2856_v31  ;;  %v2883_v55 = vsub.f32 %v49_v33, %v2862_v37  ;;  %v39_v31 = vld [vmem:[%s4060_s2 + $0x38] sm:$0xff] }
  0x21   :  { %4142 = vst [vmem:[#allocation20_spill] sm:$0xff] %v2850_v26  ;;  %v2874_v49 = vsub.f32 %v50_v23, %v2850_v26  ;;  %v36_v23 = vld [vmem:[%s4060_s2 + $0x20] sm:$0xff] }
  0x22   :  { %2190 = vmatpush3.xpose.msra.mxu0 %v2721_v12  ;;  %2242 = vmatpush3.xpose.msra.mxu1 %v324_v28  ;;  %v373_v28 = vand.u32 4294901760, %v372_v19  ;;  %v387_v59 = vand.u32 4294901760, %v386_v45 }
  0x23   :  { %2191 = vmatprep.subr.mxu0 %v2741_v20  ;;  %2243 = vmatprep.subr.mxu1 %v331_v36  ;;  %v2894_v1 = vand.u32 4294901760, %v2874_v49 }
  0x25   :  { %4147 = vst [vmem:[#allocation25_spill] sm:$0xff] %v2894_v1 }
  0x26   :  { %2192 = vmatpush3.xpose.msra.mxu0 %v2741_v20  ;;  %2244 = vmatpush3.xpose.msra.mxu1 %v331_v36  ;;  %v2859_v36 = vsub.f32 %v51_v6, %v2838_v16  ;;  %v2896_v6 = vand.u32 4294901760, %v34_v53 }
  0x27   :  { %2193 = vmatprep.subr.mxu0 %v2753_v27  ;;  %2245 = vmatprep.subr.mxu1 %v338_v44 }
  0x28   :  { %v2871_v47 = vand.u32 4294901760, %v2859_v36  ;;  %v2920_v43 = vsub.f32 %v34_v53, %v2896_v6 }
  0x2a   :  { %2194 = vmatpush3.xpose.msra.mxu0 %v2753_v27  ;;  %2246 = vmatpush3.xpose.msra.mxu1 %v338_v44  ;;  %v380_v44 = vand.u32 4294901760, %v379_v29  ;;  %4145 = vst [vmem:[#allocation23_spill] sm:$0xff] %v2871_v47  ;;  %v393_v61 = vsub.f32 %v2859_v36, %v2871_v47  ;;  %v37_v29 = vld [vmem:[%s4060_s2 + $0x28] sm:$0xff]  ;;  %4150 = vst [vmem:[#allocation28_spill] sm:$0xff] %v2920_v43  ;;  %v38_v47 = vld [vmem:[%s4060_s2 + $0x30] sm:$0xff]  ;;  %v4156_v38 = vand.u32 4294901760, %v2920_v43 }
  0x2b   :  { %2195 = vmatprep.subr.mxu0 %v2768_v34  ;;  %2247 = vmatprep.subr.mxu1 %v345_v52  ;;  %v2943_v35 = vand.u32 4294901760, %v38_v47 }
  0x2c   :  { %v394_v33 = vand.u32 4294901760, %v393_v61  ;;  %v2945_v61 = vand.u32 4294901760, %v39_v31 }
  0x2e   :  { %2196 = vmatpush3.xpose.msra.mxu0 %v2768_v34  ;;  %2248 = vmatpush3.xpose.msra.mxu1 %v345_v52  ;;  %v2876_v52 = vand.u32 4294901760, %v33_v39 }
  0x2f   :  { %2197 = vmatprep.subr.mxu0 %v2786_v42  ;;  %2249 = vmatprep.subr.mxu1 %v352_v58 }
  0x32   :  { %2198 = vmatpush3.xpose.msra.mxu0 %v2786_v42  ;;  %2250 = vmatpush3.xpose.msra.mxu1 %v352_v58  ;;  %v35_v58 = vld [vmem:[%s4060_s2 + $0x18] sm:$0xff] }
  0x33   :  { %2199 = vmatprep.subr.mxu0 %v2802_v50  ;;  %2251 = vmatprep.subr.mxu1 %v359_v0  ;;  %v2901_v19 = vand.u32 4294901760, %v35_v58 }
  0x36   :  { %2200 = vmatpush3.xpose.msra.mxu0 %v2802_v50  ;;  %2252 = vmatpush3.xpose.msra.mxu1 %v359_v0  ;;  %v2891_v0 = vand.u32 4294901760, %v48_v51 }
  0x37   :  { %2201 = vmatprep.subr.mxu0 %v2814_v57  ;;  %2253 = vmatprep.subr.mxu1 %v366_v18 }
  0x38   :  { %4146 = vst [vmem:[#allocation24_spill] sm:$0xff] %v2891_v0  ;;  %v2917_v45 = vsub.f32 %v48_v51, %v2891_v0  ;;  %v2934_v51 = vand.u32 4294901760, %v37_v29 }
  0x3a   :  { %2202 = vmatpush3.xpose.msra.mxu0 %v2814_v57  ;;  %2254 = vmatpush3.xpose.msra.mxu1 %v366_v18  ;;  %v2899_v18 = vsub.f32 %v33_v39, %v2876_v52  ;;  %v400_v39 = vsub.f32 %v2874_v49, %v2894_v1  ;;  %v2932_v1 = vsub.f32 %v35_v58, %v2901_v19  ;;  %v2941_v2 = vand.u32 4294901760, %v2917_v45 }
  0x3b   :  { %2203 = vmatprep.subr.mxu0 %v2826_v63  ;;  %2255 = vmatprep.subr.mxu1 %v373_v28  ;;  %v2972_v58 = vsub.f32 %v39_v31, %v2945_v61  ;;  %v42_v31 = vld [vmem:[%s4060_s2 + $0x50] sm:$0xff] }
  0x3c   :  { %4148 = vst [vmem:[#allocation26_spill] sm:$0xff] %v2899_v18  ;;  %4151 = vst [vmem:[#allocation29_spill] sm:$0xff] %v2932_v1  ;;  %v401_v22 = vand.u32 4294901760, %v400_v39  ;;  %v2956_v39 = vsub.f32 %v37_v29, %v2934_v51  ;;  %v414_v54 = vsub.f32 %v2917_v45, %v2941_v2  ;;  %v2969_v29 = vsub.f32 %v38_v47, %v2943_v35 }
  0x3d   :  { %4152 = vst [vmem:[#allocation30_spill] sm:$0xff] %v2941_v2 }
  0x3e   :  { %2204 = vmatpush3.xpose.msra.mxu0 %v2826_v63  ;;  %2256 = vmatpush3.xpose.msra.mxu1 %v373_v28  ;;  %v2908_v28 = vand.u32 4294901760, %v2883_v55  ;;  %4155 = vst [vmem:[#allocation32_spill] sm:$0xff] %v2956_v39  ;;  %v4159_v13 = vand.u32 4294901760, %v2956_v39 }
  0x3f   :  { %2205 = vmatprep.subr.mxu0 %v2838_v16  ;;  %2257 = vmatprep.subr.mxu1 %v380_v44 }
  0x40   :  { %4149 = vst [vmem:[#allocation27_spill] sm:$0xff] %v2908_v28  ;;  %v407_v53 = vsub.f32 %v2883_v55, %v2908_v28 }
  0x42   :  { %2206 = vmatpush3.xpose.msra.mxu0 %v2838_v16  ;;  %2258 = vmatpush3.xpose.msra.mxu1 %v380_v44  ;;  %v2922_v44 = vand.u32 4294901760, %v36_v23 }
  0x43   :  { %2207 = vmatprep.subr.mxu0 %v2850_v26  ;;  %2259 = vmatprep.subr.mxu1 %v387_v59 }
  0x44   :  { %v2949_v60 = vsub.f32 %v36_v23, %v2922_v44  ;;  %v41_v23 = vld [vmem:[%s4060_s2 + $0x48] sm:$0xff] }
  0x45   :  { %v2984_v47 = vand.u32 4294901760, %v41_v23 }
  0x46   :  { %2208 = vmatpush3.xpose.msra.mxu0 %v2850_v26  ;;  %2260 = vmatpush3.xpose.msra.mxu1 %v387_v59  ;;  %4153 = vst [vmem:[#allocation31_spill] sm:$0xff] %v2949_v60  ;;  %v4154_v59 = vand.u32 4294901760, %v2899_v18 }
  0x47   :  { %2209 = vmatprep.subr.mxu0 %v2862_v37  ;;  %2261 = vmatprep.subr.mxu1 %v394_v33 }
  0x48   :  { %v158_v28 = vsub.f32 %v2899_v18, %v4154_v59  ;;  %v408_v59 = vand.u32 4294901760, %v407_v53  ;;  %v4157_v53 = vand.u32 4294901760, %v2932_v1 }
  0x4a   :  { %2210 = vmatpush3.xpose.msra.mxu0 %v2862_v37  ;;  %2262 = vmatpush3.xpose.msra.mxu1 %v394_v33  ;;  %v168_v33 = vsub.f32 %v2920_v43, %v4156_v38  ;;  %v159_v15 = vand.u32 4294901760, %v158_v28  ;;  %v178_v14 = vsub.f32 %v2932_v1, %v4157_v53  ;;  %v43_v38 = vld [vmem:[%s4060_s2 + $0x58] sm:$0xff]  ;;  %v415_v28 = vand.u32 4294901760, %v414_v54 }
  0x4b   :  { %2211 = vmatprep.subr.mxu0 %v2891_v0  ;;  %2263 = vmatprep.subr.mxu1 %v401_v22  ;;  %v4158_v1 = vand.u32 4294901760, %v2949_v60  ;;  %v198_v54 = vsub.f32 %v2956_v39, %v4159_v13  ;;  %v3008_v53 = vsub.f32 %v41_v23, %v2984_v47  ;;  %v3010_v2 = vand.u32 4294901760, %v43_v38 }
  0x4c   :  { %v169_v30 = vand.u32 4294901760, %v168_v33  ;;  %v179_v18 = vand.u32 4294901760, %v178_v14  ;;  %v45_v14 = vld [vmem:[%s4060_s2 + $0x68] sm:$0xff]  ;;  %v4160_v13 = vand.u32 4294901760, %v2969_v29 }
  0x4d   :  { %v188_v43 = vsub.f32 %v2949_v60, %v4158_v1  ;;  %v44_v1 = vld [vmem:[%s4060_s2 + $0x60] sm:$0xff]  ;;  %v199_v60 = vand.u32 4294901760, %v198_v54  ;;  %v4114_v37 = vand.u32 4294901760, %v3008_v53  ;;  %v3034_v26 = vsub.f32 %v43_v38, %v3010_v2 }
  0x4e   :  { %2212 = vmatpush3.xpose.msra.mxu0 %v2891_v0  ;;  %2264 = vmatpush3.xpose.msra.mxu1 %v401_v22  ;;  %v3000_v0 = vsub.f32 %v40_v46, %v2978_v25  ;;  %v3002_v22 = vand.u32 4294901760, %v42_v31  ;;  %v4161_v46 = vand.u32 4294901760, %v2972_v58  ;;  %v3030_v39 = vand.u32 4294901760, %v44_v1 }
  0x4f   :  { %2265 = vmatprep.subr.mxu1 %v408_v59  ;;  %2293 = vmatprep.subr.mxu0 %v2712_v9  ;;  %v189_v33 = vand.u32 4294901760, %v188_v43  ;;  %v47_v43 = vld [vmem:[%s4060_s2 + $0x78] sm:$0xff] }
  0x50   :  { %v218_v23 = vsub.f32 %v2972_v58, %v4161_v46  ;;  %v4116_v46 = vand.u32 4294901760, %v3034_v26 }
  0x51   :  { %2214 = vmatmul.mubr.f32.vlgmr.msra.gmra.mxu0 %v159_v15  ;;  %v208_v15 = vsub.f32 %v2969_v29, %v4160_v13  ;;  %v3036_v13 = vand.u32 4294901760, %v45_v14 }
  0x52   :  { %2266 = vmatpush3.xpose.msra.mxu1 %v408_v59  ;;  %2294 = vmatpush3.xpose.msra.mxu0 %v2712_v9  ;;  %v4115_v59 = vand.u32 4294901760, %v3000_v0  ;;  %v3028_v9 = vsub.f32 %v42_v31, %v3002_v22  ;;  %v219_v31 = vand.u32 4294901760, %v218_v23 }
  0x53   :  { %2267 = vmatprep.subr.mxu1 %v415_v28  ;;  %2295 = vmatprep.subr.mxu0 %v2715_v10  ;;  %v3062_v23 = vsub.f32 %v45_v14, %v3036_v13 }
  0x54   :  { %2216 = vmatprep.mubr.f32.mxu0 %v169_v30  ;;  %v46_v30 = vld [vmem:[%s4060_s2 + $0x70] sm:$0xff]  ;;  %v228_v38 = vsub.f32 %v3000_v0, %v4115_v59  ;;  %v247_v54 = vand.u32 4294901760, %v3028_v9  ;;  %v258_v59 = vsub.f32 %v3034_v26, %v4116_v46 }
  0x55   :  { %2217 = vmatmul.mubr.f32.gmra.mxu0 %v179_v18  ;;  %v209_v18 = vand.u32 4294901760, %v208_v15  ;;  %v238_v15 = vsub.f32 %v3008_v53, %v4114_v37 }
  0x56   :  { %2268 = vmatpush3.xpose.msra.mxu1 %v415_v28  ;;  %2296 = vmatpush3.xpose.msra.mxu0 %v2715_v10  ;;  %v3052_v28 = vsub.f32 %v44_v1, %v3030_v39  ;;  %v3054_v10 = vand.u32 4294901760, %v46_v30  ;;  %v248_v1 = vsub.f32 %v3028_v9, %v247_v54 }
  0x57   :  { %2297 = vmatprep.subr.mxu0 %v2718_v11  ;;  %2349 = vmatprep.subr.mxu1 %v2702_v3 }
  0x58   :  { %2219 = vmatprep.mubr.f32.mxu0 %v189_v33  ;;  %v3064_v33 = vand.u32 4294901760, %v47_v43  ;;  %v267_v14 = vand.u32 4294901760, %v3052_v28  ;;  %v3076_v37 = vsub.f32 %v46_v30, %v3054_v10  ;;  %v249_v30 = vand.u32 4294901760, %v248_v1 }
  0x59   :  { %2270 = vmatmul.mubr.f32.vlgmr.msra.gmra.mxu1 %v2876_v52  ;;  %2220 = vmatmul.mubr.f32.gmra.mxu0 %v199_v60  ;;  %v229_v60 = vand.u32 4294901760, %v228_v38 }
  0x5a   :  { %2298 = vmatpush3.xpose.msra.mxu0 %v2718_v11  ;;  %2350 = vmatpush3.xpose.msra.mxu1 %v2702_v3  ;;  %v239_v11 = vand.u32 4294901760, %v238_v15  ;;  %v3084_v38 = vsub.f32 %v47_v43, %v3064_v33  ;;  %v287_v15 = vand.u32 4294901760, %v3076_v37 }
  0x5b   :  { %2299 = vmatprep.subr.mxu0 %v2734_v17  ;;  %2351 = vmatprep.subr.mxu1 %v2704_v4 }
  0x5c   :  { %2272 = vmatprep.mubr.f32.mxu1 %v2896_v6  ;;  %2222 = vmatprep.mubr.f32.mxu0 %v209_v18  ;;  %v277_v18 = vand.u32 4294901760, %v3062_v23  ;;  %v297_v46 = vand.u32 4294901760, %v3084_v38 }
  0x5d   :  { %2273 = vmatmul.mubr.f32.gmra.mxu1 %v2901_v19  ;;  %2223 = vmatmul.mubr.f32.gmra.mxu0 %v219_v31  ;;  %v268_v31 = vsub.f32 %v3052_v28, %v267_v14 }
  0x5e   :  { %2300 = vmatpush3.xpose.msra.mxu0 %v2734_v17  ;;  %2352 = vmatpush3.xpose.msra.mxu1 %v2704_v4  ;;  %v259_v17 = vand.u32 4294901760, %v258_v59  ;;  %v278_v43 = vsub.f32 %v3062_v23, %v277_v18  ;;  %v288_v59 = vsub.f32 %v3076_v37, %v287_v15 }
  0x5f   :  { %2301 = vmatprep.subr.mxu0 %v2744_v21  ;;  %2353 = vmatprep.subr.mxu1 %v2706_v5 }
  0x60   :  { %2275 = vmatprep.mubr.f32.mxu1 %v2922_v44  ;;  %2225 = vmatprep.mubr.f32.mxu0 %v229_v60  ;;  %v269_v60 = vand.u32 4294901760, %v268_v31  ;;  %v279_v1 = vand.u32 4294901760, %v278_v43  ;;  %v4176_v43 = vld [vmem:[#allocation11_spill] sm:$0xff] }
  0x61   :  { %2276 = vmatmul.mubr.f32.gmra.mxu1 %v2934_v51  ;;  %2226 = vmatmul.mubr.f32.gmra.mxu0 %v239_v11  ;;  %v289_v11 = vand.u32 4294901760, %v288_v59  ;;  %v4179_v59 = vld [vmem:[#allocation12_spill] sm:$0xff] }
  0x62   :  { %2302 = vmatpush3.xpose.msra.mxu0 %v2744_v21  ;;  %2354 = vmatpush3.xpose.msra.mxu1 %v2706_v5  ;;  %v298_v21 = vsub.f32 %v3084_v38, %v297_v46 }
  0x63   :  { %2303 = vmatprep.subr.mxu0 %v2762_v32  ;;  %2355 = vmatprep.subr.mxu1 %v2708_v8 }
  0x64   :  { %2278 = vmatprep.mubr.f32.mxu1 %v2943_v35  ;;  %2228 = vmatprep.mubr.f32.mxu0 %v249_v30  ;;  %v299_v30 = vand.u32 4294901760, %v298_v21  ;;  %v4182_v21 = vld [vmem:[#allocation14_spill] sm:$0xff] }
  0x65   :  { %2279 = vmatmul.mubr.f32.gmra.mxu1 %v2945_v61  ;;  %2229 = vmatmul.mubr.f32.gmra.mxu0 %v259_v17 }
  0x66   :  { %2304 = vmatpush3.xpose.msra.mxu0 %v2762_v32  ;;  %2356 = vmatpush3.xpose.msra.mxu1 %v2708_v8  ;;  %v4162_v32 = vand.u32 4294901760, %v2782_v41 }
  0x67   :  { %2305 = vmatprep.subr.mxu0 %v2779_v40  ;;  %2357 = vmatprep.subr.mxu1 %v2721_v12 }
  0x68   :  { %2281 = vmatprep.mubr.f32.mxu1 %v2978_v25  ;;  %2231 = vmatprep.mubr.f32.mxu0 %v269_v60 }
  0x69   :  { %2282 = vmatmul.mubr.f32.gmra.mxu1 %v2984_v47  ;;  %2232 = vmatmul.mubr.f32.gmra.mxu0 %v279_v1 }
  0x6a   :  { %2306 = vmatpush3.xpose.msra.mxu0 %v2779_v40  ;;  %2358 = vmatpush3.xpose.msra.mxu1 %v2721_v12  ;;  %v4163_v40 = vld [vmem:[#allocation20_spill] sm:$0xff] }
  0x6b   :  { %2307 = vmatprep.subr.mxu0 %v2796_v48  ;;  %2359 = vmatprep.subr.mxu1 %v2741_v20 }
  0x6c   :  { %2284 = vmatprep.mubr.f32.mxu1 %v3002_v22  ;;  %2234 = vmatprep.mubr.f32.mxu0 %v289_v11  ;;  %v4183_v11 = vand.u32 4294901760, %v2972_v58 }
  0x6d   :  { %2285 = vmatmul.mubr.f32.gmra.mxu1 %v3010_v2  ;;  %2235 = vmatmul.mubr.f32.gmra.mxu0 %v299_v30  ;;  %v4186_v30 = vand.u32 4294901760, %v3008_v53 }
  0x6e   :  { %2308 = vmatpush3.xpose.msra.mxu0 %v2796_v48  ;;  %2360 = vmatpush3.xpose.msra.mxu1 %v2741_v20  ;;  %v4165_v48 = vld [vmem:[#allocation8_spill] sm:$0xff] }
  0x6f   :  { %2309 = vmatprep.subr.mxu0 %v2811_v56  ;;  %2361 = vmatprep.subr.mxu1 %v2753_v27 }
  0x70   :  { %2287 = vmatprep.mubr.f32.mxu1 %v3030_v39  ;;  %2325 = vmatprep.mubr.f32.mxu0 %v2782_v41  ;;  %v4164_v41 = vld [vmem:[#allocation22_spill] sm:$0xff] }
  0x71   :  { %2288 = vmatmul.mubr.f32.gmra.mxu1 %v3036_v13 }
  0x72   :  { %2310 = vmatpush3.xpose.msra.mxu0 %v2811_v56  ;;  %2362 = vmatpush3.xpose.msra.mxu1 %v2753_v27  ;;  %v4166_v56 = vld [vmem:[#allocation26_spill] sm:$0xff] }
  0x73   :  { %2311 = vmatprep.subr.mxu0 %v2823_v62  ;;  %2363 = vmatprep.subr.mxu1 %v2768_v34  ;;  %v4174_v31 = vand.u32 4294901760, %v4166_v56 }
  0x74   :  { %2290 = vmatprep.mubr.f32.mxu1 %v3054_v10 }
  0x75   :  { %2291 = vmatmul.mubr.f32.gmra.mxu1 %v3064_v33 }
  0x76   :  { %2312 = vmatpush3.xpose.msra.mxu0 %v2823_v62  ;;  %2364 = vmatpush3.xpose.msra.mxu1 %v2768_v34  ;;  %v4167_v62 = vld [vmem:[#allocation28_spill] sm:$0xff] }
  0x77   :  { %2313 = vmatprep.subr.mxu0 %v2835_v7  ;;  %2365 = vmatprep.subr.mxu1 %v2786_v42  ;;  %v4175_v17 = vand.u32 4294901760, %v4167_v62 }
  0x78   :  { %2381 = vmatprep.mubr.f32.mxu1 %v4162_v32 }
  0x7a   :  { %2314 = vmatpush3.xpose.msra.mxu0 %v2835_v7  ;;  %2366 = vmatpush3.xpose.msra.mxu1 %v2786_v42  ;;  %v4168_v7 = vld [vmem:[#allocation24_spill] sm:$0xff] }
  0x7b   :  { %2315 = vmatprep.subr.mxu0 %v2847_v24  ;;  %2367 = vmatprep.subr.mxu1 %v2802_v50 }
  0x7e   :  { %2316 = vmatpush3.xpose.msra.mxu0 %v2847_v24  ;;  %2368 = vmatpush3.xpose.msra.mxu1 %v2802_v50  ;;  %v4169_v24 = vld [vmem:[#allocation9_spill] sm:$0xff] }
  0x7f   :  { %2317 = vmatprep.subr.mxu0 %v2859_v36  ;;  %2369 = vmatprep.subr.mxu1 %v2814_v57 }
  0x82   :  { %2318 = vmatpush3.xpose.msra.mxu0 %v2859_v36  ;;  %2370 = vmatpush3.xpose.msra.mxu1 %v2814_v57  ;;  %v4170_v36 = vld [vmem:[#allocation29_spill] sm:$0xff] }
  0x83   :  { %2319 = vmatprep.subr.mxu0 %v2874_v49  ;;  %2371 = vmatprep.subr.mxu1 %v2826_v63  ;;  %v4177_v60 = vand.u32 4294901760, %v4170_v36 }
  0x86   :  { %2320 = vmatpush3.xpose.msra.mxu0 %v2874_v49  ;;  %2372 = vmatpush3.xpose.msra.mxu1 %v2826_v63  ;;  %v4171_v49 = vld [vmem:[#allocation31_spill] sm:$0xff] }
  0x87   :  { %2321 = vmatprep.subr.mxu0 %v2883_v55  ;;  %2373 = vmatprep.subr.mxu1 %v2838_v16 }
  0x8a   :  { %2322 = vmatpush3.xpose.msra.mxu0 %v2883_v55  ;;  %2374 = vmatpush3.xpose.msra.mxu1 %v2838_v16  ;;  %v4172_v55 = vld [vmem:[#allocation10_spill] sm:$0xff] }
  0x8b   :  { %2323 = vmatprep.subr.mxu0 %v2917_v45  ;;  %2375 = vmatprep.subr.mxu1 %v4163_v40 }
  0x8e   :  { %2324 = vmatpush3.xpose.msra.mxu0 %v2917_v45  ;;  %2376 = vmatpush3.xpose.msra.mxu1 %v4163_v40  ;;  %v4173_v45 = vld [vmem:[#allocation32_spill] sm:$0xff] }
  0x8f   :  { %2377 = vmatprep.subr.mxu1 %v4164_v41  ;;  %2405 = vmatprep.subr.mxu0 %v4165_v48  ;;  %v4180_v1 = vand.u32 4294901760, %v4173_v45 }
  0x91   :  { %2326 = vmatmul.mubr.f32.vlgmr.msra.gmra.mxu0 %v4166_v56 }
  0x92   :  { %2378 = vmatpush3.xpose.msra.mxu1 %v4164_v41  ;;  %2406 = vmatpush3.xpose.msra.mxu0 %v4165_v48 }
  0x93   :  { %2328 = vmatprep.mubr.f32.mxu0 %v4167_v62  ;;  %2379 = vmatprep.subr.mxu1 %v4168_v7 }
  0x94   :  { %2407 = vmatprep.subr.mxu0 %v4169_v24 }
  0x95   :  { %2329 = vmatmul.mubr.f32.gmra.mxu0 %v4170_v36 }
  0x96   :  { %2380 = vmatpush3.xpose.msra.mxu1 %v4168_v7  ;;  %2408 = vmatpush3.xpose.msra.mxu0 %v4169_v24 }
  0x97   :  { %2331 = vmatprep.mubr.f32.mxu0 %v4171_v49  ;;  %2409 = vmatprep.subr.mxu0 %v4172_v55 }
  0x98   :  { %2461 = vmatprep.subr.mxu1 %v2702_v3 }
  0x99   :  { %2332 = vmatmul.mubr.f32.gmra.mxu0 %v4173_v45  ;;  %2382 = vmatmul.mubr.f32.vlgmr.msra.gmra.mxu1 %v4174_v31 }
  0x9a   :  { %2410 = vmatpush3.xpose.msra.mxu0 %v4172_v55  ;;  %2462 = vmatpush3.xpose.msra.mxu1 %v2702_v3  ;;  %v4178_v3 = vand.u32 4294901760, %v4171_v49 }
  0x9b   :  { %2334 = vmatprep.mubr.f32.mxu0 %v2969_v29  ;;  %2384 = vmatprep.mubr.f32.mxu1 %v4175_v17 }
  0x9c   :  { %2411 = vmatprep.subr.mxu0 %v4176_v43  ;;  %2463 = vmatprep.subr.mxu1 %v2704_v4 }
  0x9d   :  { %2335 = vmatmul.mubr.f32.gmra.mxu0 %v2972_v58  ;;  %2385 = vmatmul.mubr.f32.gmra.mxu1 %v4177_v60  ;;  %v4190_v58 = vld [vmem:[#allocation13_spill] sm:$0xff] }
  0x9e   :  { %2412 = vmatpush3.xpose.msra.mxu0 %v4176_v43  ;;  %2464 = vmatpush3.xpose.msra.mxu1 %v2704_v4  ;;  %v4181_v4 = vand.u32 4294901760, %v2969_v29  ;;  %v4185_v29 = vld [vmem:[#allocation15_spill] sm:$0xff] }
  0x9f   :  { %2337 = vmatprep.mubr.f32.mxu0 %v3000_v0  ;;  %2387 = vmatprep.mubr.f32.mxu1 %v4178_v3 }
  0xa0   :  { %2413 = vmatprep.subr.mxu0 %v4179_v59  ;;  %2465 = vmatprep.subr.mxu1 %v2706_v5 }
  0xa1   :  { %2338 = vmatmul.mubr.f32.gmra.mxu0 %v3008_v53  ;;  %2388 = vmatmul.mubr.f32.gmra.mxu1 %v4180_v1  ;;  %v2668_v53 = vmov 0  }
  0xa2   :  { %2414 = vmatpush3.xpose.msra.mxu0 %v4179_v59  ;;  %2466 = vmatpush3.xpose.msra.mxu1 %v2706_v5  ;;  %v4184_v5 = vand.u32 4294901760, %v3000_v0  ;;  %v4188_v0 = vand.u32 4294901760, %v3034_v26 }
  0xa3   :  { %2340 = vmatprep.mubr.f32.mxu0 %v3028_v9  ;;  %2390 = vmatprep.mubr.f32.mxu1 %v4181_v4  ;;  %v1441_v9 = vld [vmem:[%s4058_s0 + $0x18] sm:$0xff] }
  0xa4   :  { %2415 = vmatprep.subr.mxu0 %v4182_v21  ;;  %2467 = vmatprep.subr.mxu1 %v2708_v8 }
  0xa5   :  { %2341 = vmatmul.mubr.f32.gmra.mxu0 %v3034_v26  ;;  %2391 = vmatmul.mubr.f32.gmra.mxu1 %v4183_v11  ;;  %v1439_v26 = vld [vmem:[%s4058_s0 + $0x8] sm:$0xff] }
  0xa6   :  { %2416 = vmatpush3.xpose.msra.mxu0 %v4182_v21  ;;  %2468 = vmatpush3.xpose.msra.mxu1 %v2708_v8  ;;  %v4187_v8 = vld [vmem:[#allocation16_spill] sm:$0xff]  ;;  %v1367_v21 = vlaneseq }
  0xa7   :  { %2343 = vmatprep.mubr.f32.mxu0 %v3052_v28  ;;  %2393 = vmatprep.mubr.f32.mxu1 %v4184_v5 }
  0xa8   :  { %2417 = vmatprep.subr.mxu0 %v4185_v29  ;;  %2469 = vmatprep.subr.mxu1 %v2721_v12  ;;  %v3416_v5 = vshrl.u32 %v1367_v21, 7 }
  0xa9   :  { %2344 = vmatmul.mubr.f32.gmra.mxu0 %v3062_v23  ;;  %2394 = vmatmul.mubr.f32.gmra.mxu1 %v4186_v30 }
  0xaa   :  { %2418 = vmatpush3.xpose.msra.mxu0 %v4185_v29  ;;  %2470 = vmatpush3.xpose.msra.mxu1 %v2721_v12  ;;  %v4189_v12 = vld [vmem:[#allocation17_spill] sm:$0xff]  ;;  %4207 = vst [vmem:[#allocation10_spill] sm:$0xff] %v3416_v5 }
  0xab   :  { %2346 = vmatprep.mubr.f32.mxu0 %v3076_v37  ;;  %2396 = vmatprep.mubr.f32.mxu1 %v247_v54  ;;  %v4193_v37 = vld [vmem:[#allocation21_spill] sm:$0xff] }
  0xac   :  { %2419 = vmatprep.subr.mxu0 %v4187_v8  ;;  %2471 = vmatprep.subr.mxu1 %v2741_v20  ;;  %v4195_v54 = vld [vmem:[#allocation25_spill] sm:$0xff] }
  0xad   :  { %2347 = vmatmul.mubr.f32.gmra.mxu0 %v3084_v38  ;;  %2397 = vmatmul.mubr.f32.gmra.mxu1 %v4188_v0  ;;  %v3423_v0 = vadd.s32 72, %v3416_v5 }
  0xae   :  { %2420 = vmatpush3.xpose.msra.mxu0 %v4187_v8  ;;  %2472 = vmatpush3.xpose.msra.mxu1 %v2741_v20  ;;  %v4191_v20 = vld [vmem:[#allocation18_spill] sm:$0xff] }
  0xaf   :  { %2399 = vmatprep.mubr.f32.mxu1 %v267_v14  ;;  %2421 = vmatprep.subr.mxu0 %v4189_v12  ;;  %4210 = vst [vmem:[#allocation12_spill] sm:$0xff] %v3423_v0 }
  0xb0   :  { %2473 = vmatprep.subr.mxu1 %v2753_v27  ;;  %2437 = vmatprep.mubr.f32.mxu0 %v4190_v58 }
  0xb1   :  { %2400 = vmatmul.mubr.f32.gmra.mxu1 %v277_v18  ;;  %2524 = vset.pattern.permute.xlu1 %v2668_v53 }
  0xb2   :  { %2422 = vmatpush3.xpose.msra.mxu0 %v4189_v12  ;;  %2474 = vmatpush3.xpose.msra.mxu1 %v2753_v27  ;;  %v4192_v27 = vld [vmem:[#allocation19_spill] sm:$0xff] }
  0xb3   :  { %2402 = vmatprep.mubr.f32.mxu1 %v287_v15  ;;  %2423 = vmatprep.subr.mxu0 %v4191_v20 }
  0xb4   :  { %2475 = vmatprep.subr.mxu1 %v2768_v34  ;;  %1459 = vperm.xlu1 %2524, %v1439_v26   ;;  %v3427_v26 = vand.u32 127, %v1367_v21 }
  0xb5   :  { %2403 = vmatmul.mubr.f32.gmra.mxu1 %v297_v46  ;;  %2523 = vset.pattern.permute.xlu0 %v2668_v53 }
  0xb6   :  { %2424 = vmatpush3.xpose.msra.mxu0 %v4191_v20  ;;  %2476 = vmatpush3.xpose.msra.mxu1 %v2768_v34  ;;  %v4194_v34 = vld [vmem:[#allocation23_spill] sm:$0xff]  ;;  %v3432_v20 = vld [vmem:[%s4059_s1] ss:$0 sm:$0xff]  ;;  %vm1413_vm0 = vcmp.ne.s32.totalorder %v3427_v26, %v3423_v0  ;;  %vm1403_vm3 = vcmp.lt.s32.totalorder %v3427_v26, 16 }
  0xb7   :  { %2425 = vmatprep.subr.mxu0 %v4192_v27  ;;  %2477 = vmatprep.subr.mxu1 %v2786_v42  ;;  %4212 = vst [vmem:[#allocation15_spill] sm:$0xff] %v3432_v20 }
  0xb8   :  { %2493 = vmatprep.mubr.f32.mxu1 %v4190_v58  ;;  %1465 = vperm.xlu1 %2524, %v1441_v9  }
  0xba   :  { %2426 = vmatpush3.xpose.msra.mxu0 %v4192_v27  ;;  %2478 = vmatpush3.xpose.msra.mxu1 %v2786_v42  ;;  %v4196_v42 = vld [vmem:[#allocation27_spill] sm:$0xff] }
  0xbb   :  { %2427 = vmatprep.subr.mxu0 %v4193_v37  ;;  %2479 = vmatprep.subr.mxu1 %v2802_v50 }
  0xbe   :  { %2428 = vmatpush3.xpose.msra.mxu0 %v4193_v37  ;;  %2480 = vmatpush3.xpose.msra.mxu1 %v2802_v50  ;;  %v4197_v50 = vld [vmem:[#allocation30_spill] sm:$0xff] }
  0xbf   :  { %2429 = vmatprep.subr.mxu0 %v4194_v34  ;;  %2481 = vmatprep.subr.mxu1 %v2814_v57 }
  0xc2   :  { %2430 = vmatpush3.xpose.msra.mxu0 %v4194_v34  ;;  %2482 = vmatpush3.xpose.msra.mxu1 %v2814_v57  ;;  %v1442_v57 = vld [vmem:[%s4058_s0 + $0x20] sm:$0xff]  ;;  %v4213_v34 = vmov 0 }
  0xc3   :  { %2431 = vmatprep.subr.mxu0 %v4195_v54  ;;  %2483 = vmatprep.subr.mxu1 %v2826_v63 }
  0xc4   :  { %1468 = vperm.xlu1 %2524, %v1442_v57  }
  0xc6   :  { %2432 = vmatpush3.xpose.msra.mxu0 %v4195_v54  ;;  %2484 = vmatpush3.xpose.msra.mxu1 %v2826_v63  ;;  %v1443_v63 = vld [vmem:[%s4058_s0 + $0x28] sm:$0xff] }
  0xc7   :  { %2433 = vmatprep.subr.mxu0 %v4196_v42  ;;  %2485 = vmatprep.subr.mxu1 %v2838_v16 }
  0xc8   :  { %1471 = vperm.xlu1 %2524, %v1443_v63  }
  0xca   :  { %2434 = vmatpush3.xpose.msra.mxu0 %v4196_v42  ;;  %2486 = vmatpush3.xpose.msra.mxu1 %v2838_v16  ;;  %v1444_v16 = vld [vmem:[%s4058_s0 + $0x30] sm:$0xff] }
  0xcb   :  { %2435 = vmatprep.subr.mxu0 %v4197_v50  ;;  %2487 = vmatprep.subr.mxu1 %v4163_v40 }
  0xcc   :  { %1474 = vperm.xlu1 %2524, %v1444_v16  }
  0xce   :  { %2436 = vmatpush3.xpose.msra.mxu0 %v4197_v50  ;;  %2488 = vmatpush3.xpose.msra.mxu1 %v4163_v40 }
  0xcf   :  { %2489 = vmatprep.subr.mxu1 %v4164_v41 }
  0xd1   :  { %2438 = vmatmul.mubr.f32.vlgmr.msra.gmra.mxu0 %v2876_v52 }
  0xd2   :  { %2490 = vmatpush3.xpose.msra.mxu1 %v4164_v41  ;;  %2440 = vmatprep.mubr.f32.mxu0 %v2896_v6 }
  0xd3   :  { %2491 = vmatprep.subr.mxu1 %v4168_v7 }
  0xd5   :  { %2441 = vmatmul.mubr.f32.gmra.mxu0 %v2901_v19 }
  0xd6   :  { %2492 = vmatpush3.xpose.msra.mxu1 %v4168_v7  ;;  %2443 = vmatprep.mubr.f32.mxu0 %v2922_v44 }
  0xd9   :  { %2444 = vmatmul.mubr.f32.gmra.mxu0 %v2934_v51  ;;  %2494 = vmatmul.mubr.f32.vlgmr.msra.gmra.mxu1 %v2876_v52  ;;  %v1445_v52 = vld [vmem:[%s4058_s0 + $0x38] sm:$0xff] }
  0xda   :  { %2446 = vmatprep.mubr.f32.mxu0 %v2943_v35  ;;  %2496 = vmatprep.mubr.f32.mxu1 %v2896_v6  ;;  %v1447_v6 = vld [vmem:[%s4058_s0 + $0x48] sm:$0xff] }
  0xdb   :  { %1477 = vperm.xlu1 %2524, %v1445_v52  }
  0xdd   :  { %2447 = vmatmul.mubr.f32.gmra.mxu0 %v2945_v61  ;;  %2497 = vmatmul.mubr.f32.gmra.mxu1 %v2901_v19  ;;  %v1449_v19 = vld [vmem:[%s4058_s0 + $0x58] sm:$0xff] }
  0xde   :  { %2449 = vmatprep.mubr.f32.mxu0 %v2978_v25  ;;  %2499 = vmatprep.mubr.f32.mxu1 %v2922_v44  ;;  %v1446_v44 = vld [vmem:[%s4058_s0 + $0x40] sm:$0xff] }
  0xdf   :  { %1483 = vperm.xlu1 %2524, %v1447_v6  }
  0xe1   :  { %2450 = vmatmul.mubr.f32.gmra.mxu0 %v2984_v47  ;;  %2500 = vmatmul.mubr.f32.gmra.mxu1 %v2934_v51 }
  0xe2   :  { %2452 = vmatprep.mubr.f32.mxu0 %v3002_v22  ;;  %2502 = vmatprep.mubr.f32.mxu1 %v2943_v35  ;;  %v1438_v35 = vld [vmem:[%s4058_s0] sm:$0xff] }
  0xe3   :  { %1489 = vperm.xlu1 %2524, %v1449_v19   ;;  %1456 = vperm.xlu0 %2523, %v1438_v35  }
  0xe5   :  { %2453 = vmatmul.mubr.f32.gmra.mxu0 %v3010_v2  ;;  %2503 = vmatmul.mubr.f32.gmra.mxu1 %v2945_v61  ;;  %v1448_v61 = vld [vmem:[%s4058_s0 + $0x50] sm:$0xff] }
  0xe6   :  { %2455 = vmatprep.mubr.f32.mxu0 %v3030_v39  ;;  %2505 = vmatprep.mubr.f32.mxu1 %v2978_v25  ;;  %v1440_v25 = vld [vmem:[%s4058_s0 + $0x10] sm:$0xff] }
  0xe7   :  { %1462 = vperm.xlu0 %2523, %v1440_v25  }
  0xe9   :  { %2456 = vmatmul.mubr.f32.gmra.mxu0 %v3036_v13  ;;  %2506 = vmatmul.mubr.f32.gmra.mxu1 %v2984_v47 }
  0xea   :  { %2458 = vmatprep.mubr.f32.mxu0 %v3054_v10  ;;  %2508 = vmatprep.mubr.f32.mxu1 %v3002_v22 }
  0xeb   :  { %1480 = vperm.xlu0 %2523, %v1446_v44  }
  0xed   :  { %2459 = vmatmul.mubr.f32.gmra.mxu0 %v3064_v33  ;;  %2509 = vmatmul.mubr.f32.gmra.mxu1 %v3010_v2 }
  0xee   :  { %2511 = vmatprep.mubr.f32.mxu1 %v3030_v39 }
  0xef   :  { %1486 = vperm.xlu0 %2523, %v1448_v61  }
  0xf1   :  { %2512 = vmatmul.mubr.f32.gmra.mxu1 %v3036_v13 }
  0xf2   :  { %2514 = vmatprep.mubr.f32.mxu1 %v3054_v10 }
  0xf5   :  { %2515 = vmatmul.mubr.f32.gmra.mxu1 %v3064_v33 }
 0x111   :  { %v3346_v51 = vpop.f32.mrf.mxu0 }
 0x113   :  { %v3348_v2 = vpop.f32.mrf.mxu0 }
 0x115   :  { %v3350_v39 = vpop.f32.mrf.mxu0 }
 0x117   :  { %v3354_v22 = vpop.f32.mrf.mxu0 }
 0x119   :  { %v3352_v47 = vpop.f32.mrf.mxu1  ;;  %v3358_v28 = vpop.f32.mrf.mxu0 }
 0x11b   :  { %v3356_v13 = vpop.f32.mrf.mxu1  ;;  %v3362_v46 = vpop.f32.mrf.mxu0 }
 0x11d   :  { %v3360_v10 = vpop.f32.mrf.mxu1  ;;  %v3366_v33 = vpop.f32.mrf.mxu0 }
 0x11f   :  { %v3364_v23 = vpop.f32.mrf.mxu1  ;;  %v3370_v18 = vpop.f32.mrf.mxu0 }
 0x121   :  { %v3368_v14 = vpop.f32.mrf.mxu1  ;;  %v3374_v15 = vpop.f32.mrf.mxu0 }
 0x123   :  { %v3372_v38 = vpop.f32.mrf.mxu1  ;;  %v3378_v40 = vpop.f32.mrf.mxu0 }
 0x125   :  { %v3376_v32 = vpop.f32.mrf.mxu1  ;;  %v3382_v48 = vpop.f32.mrf.mxu0 }
 0x127   :  { %v3380_v41 = vpop.f32.mrf.mxu1  ;;  %v3386_v62 = vpop.f32.mrf.mxu0 }
 0x129   :  { %v3384_v56 = vpop.f32.mrf.mxu1  ;;  %v3392_v36 = vpop.f32.mrf.mxu0 }
 0x12b   :  { %v3388_v7 = vpop.f32.mrf.mxu1  ;;  %v3396_v55 = vpop.f32.mrf.mxu0 }
 0x12c   :  { %4199 = vst [vmem:[#allocation22_spill] sm:$0xff] %v3396_v55  ;;  %v483_v55 = vadd.f32 %v3368_v14, %v3358_v28  ;;  %v495_v28 = vadd.f32 %v3376_v32, %v3366_v33 }
 0x12d   :  { %v3394_v49 = vpop.f32.mrf.mxu1  ;;  %v3402_v17 = vpop.f32.mrf.mxu0 }
 0x12e   :  { %4201 = vst [vmem:[#allocation26_spill] sm:$0xff] %v3402_v17 }
 0x12f   :  { %v3390_v24 = vpop.permute.xlu1 %1459  ;;  %v3400_v31 = vpop.f32.mrf.mxu1 }
 0x130   :  { %4198 = vst [vmem:[#allocation20_spill] sm:$0xff] %v3390_v24  ;;  %v3408_v3 = vpop.f32.mrf.mxu0 }
 0x131   :  { %v3404_v43 = vpop.f32.mrf.mxu1  ;;  %4203 = vst [vmem:[#allocation24_spill] sm:$0xff] %v3408_v3 }
 0x133   :  { %v3398_v45 = vpop.permute.xlu1 %1465  ;;  %v3410_v59 = vpop.f32.mrf.mxu1 }
 0x134   :  { %4200 = vst [vmem:[#allocation8_spill] sm:$0xff] %v3398_v45  ;;  %4204 = vst [vmem:[#allocation9_spill] sm:$0xff] %v3410_v59  ;;  %v465_v59 = vadd.f32 %v3364_v23, %v3354_v22 }
 0x135   :  { %v3414_v11 = vpop.f32.mrf.mxu1 }
 0x136   :  { %4206 = vst [vmem:[#allocation31_spill] sm:$0xff] %v3414_v11 }
 0x137   :  { %v3420_v8 = vpop.f32.mrf.mxu1 }
 0x138   :  { %4209 = vst [vmem:[#allocation11_spill] sm:$0xff] %v3420_v8  ;;  %v459_v8 = vadd.f32 %v3352_v47, %v3346_v51 }
 0x13f   :  { %v3406_v60 = vpop.permute.xlu1 %1468 }
 0x140   :  { %4202 = vst [vmem:[#allocation28_spill] sm:$0xff] %v3406_v60 }
 0x143   :  { %v3412_v1 = vpop.permute.xlu1 %1471 }
 0x144   :  { %4205 = vst [vmem:[#allocation29_spill] sm:$0xff] %v3412_v1 }
 0x147   :  { %v3418_v29 = vpop.permute.xlu1 %1474 }
 0x148   :  { %4208 = vst [vmem:[#allocation32_spill] sm:$0xff] %v3418_v29 }
 0x151   :  { %v2327_v4 = vpop.f32.mrf.mxu0 }
 0x152   :  { %v654_v17 = vadd.f32 %v2327_v4, %v459_v8 }
 0x153   :  { %v646_v30 = vpop.f32.mrf.mxu0 }
 0x155   :  { %v2330_v58 = vpop.f32.mrf.mxu0 }
 0x156   :  { %v3425_v12 = vpop.permute.xlu1 %1477 }
 0x157   :  { %4211 = vst [vmem:[#allocation14_spill] sm:$0xff] %v3425_v12  ;;  %v660_v27 = vpop.f32.mrf.mxu0 }
 0x158   :  { %v661_v4 = vadd.f32 %v660_v27, %v465_v59 }
 0x159   :  { %v2383_v53 = vpop.f32.mrf.mxu1  ;;  %v2333_v54 = vpop.f32.mrf.mxu0 }
 0x15a   :  { %v1484_v9 = vpop.permute.xlu1 %1483 }
 0x15b   :  { %v840_v37 = vpop.f32.mrf.mxu1  ;;  %vm1516_vm1 = vcmp.eq.s32.totalorder %v1484_v9, %v3432_v20  ;;  %v674_v50 = vpop.f32.mrf.mxu0 }
 0x15c   :  { %vm3440_vm2 = vmand %vm1516_vm1, %vm1413_vm0 }
 0x15d   :  { %v4214_v34 = vsel %vm3440_vm2, 4294967295, %v4213_v34  ;;  %v2386_v42 = vpop.f32.mrf.mxu1  ;;  %v2336_v63 = vpop.f32.mrf.mxu0 }
 0x15e   :  { %4215 = vst [vmem:[#allocation16_spill] sm:$0xff] %v4214_v34 }
 0x15f   :  { %v856_v57 = vpop.f32.mrf.mxu1  ;;  %v3444_v52 = vpop.f32.mrf.mxu0 }
 0x160   :  { %v857_v22 = vadd.f32 %v856_v57, %v661_v4 }
 0x161   :  { %v2389_v16 = vpop.f32.mrf.mxu1  ;;  %v3446_v19 = vpop.f32.mrf.mxu0 }
 0x163   :  { %v872_v6 = vpop.f32.mrf.mxu1  ;;  %v3450_v25 = vpop.f32.mrf.mxu0 }
 0x165   :  { %v3448_v35 = vpop.f32.mrf.mxu1  ;;  %v3454_v61 = vpop.f32.mrf.mxu0 }
 0x167   :  { %v3452_v44 = vpop.f32.mrf.mxu1  ;;  %v3458_v9 = vpop.f32.mrf.mxu0 }
 0x169   :  { %v3456_v21 = vpop.f32.mrf.mxu1  ;;  %v3462_v60 = vpop.f32.mrf.mxu0 }
 0x16a   :  { %4216 = vst [vmem:[#allocation17_spill] sm:$0xff] %v3462_v60  ;;  %v849_v60 = vadd.f32 %v2383_v53, %v654_v17  ;;  %v682_v17 = vadd.f32 %v2333_v54, %v483_v55  ;;  %v696_v55 = vadd.f32 %v2336_v63, %v495_v28 }
 0x16b   :  { %v3460_v29 = vpop.f32.mrf.mxu1  ;;  %v3466_v34 = vpop.f32.mrf.mxu0 }
 0x16c   :  { %4218 = vst [vmem:[#allocation18_spill] sm:$0xff] %v3466_v34  ;;  %v453_v34 = vadd.f32 %v3356_v13, %v3348_v2  ;;  %v881_v59 = vadd.f32 %v2389_v16, %v682_v17  ;;  %v897_v54 = vadd.f32 %v3448_v35, %v696_v55  ;;  %v513_v17 = vadd.f32 %v3400_v31, %v3386_v62 }
 0x16d   :  { %v3464_v24 = vpop.f32.mrf.mxu1  ;;  %v3470_v1 = vpop.f32.mrf.mxu0 }
 0x16e   :  { %4217 = vst [vmem:[#allocation13_spill] sm:$0xff] %v3464_v24  ;;  %4220 = vst [vmem:[#allocation21_spill] sm:$0xff] %v3470_v1  ;;  %v471_v1 = vadd.f32 %v3360_v10, %v3350_v39  ;;  %v477_v10 = vadd.f32 %v3372_v38, %v3362_v46  ;;  %v489_v38 = vadd.f32 %v3380_v41, %v3370_v18 }
 0x16f   :  { %v3468_v12 = vpop.f32.mrf.mxu1  ;;  %v3474_v20 = vpop.f32.mrf.mxu0 }
 0x170   :  { %4219 = vst [vmem:[#allocation19_spill] sm:$0xff] %v3468_v12  ;;  %4222 = vst [vmem:[#allocation25_spill] sm:$0xff] %v3474_v20  ;;  %v668_v51 = vadd.f32 %v2330_v58, %v471_v1  ;;  %v675_v14 = vadd.f32 %v674_v50, %v477_v10 }
 0x171   :  { %v3472_v45 = vpop.f32.mrf.mxu1 }
 0x172   :  { %4221 = vst [vmem:[#allocation23_spill] sm:$0xff] %v3472_v45  ;;  %v647_v45 = vadd.f32 %v646_v30, %v453_v34  ;;  %v865_v8 = vadd.f32 %v2386_v42, %v668_v51  ;;  %v689_v34 = vadd.f32 %v3444_v52, %v489_v38 }
 0x173   :  { %v3476_v0 = vpop.f32.mrf.mxu1 }
 0x174   :  { %4223 = vst [vmem:[#allocation27_spill] sm:$0xff] %v3476_v0  ;;  %v841_v47 = vadd.f32 %v840_v37, %v647_v45  ;;  %v889_v52 = vadd.f32 %v3452_v44, %v689_v34 }
 0x175   :  { %v3480_v3 = vpop.f32.mrf.mxu1  ;;  %v4225_v62 = vld [vmem:[#allocation13_spill] sm:$0xff] }
 0x176   :  { %4224 = vst [vmem:[#allocation30_spill] sm:$0xff] %v3480_v3 }
 0x177   :  { %v3486_v20 = vpop.f32.mrf.mxu1 }
 0x191   :  { %v2439_v5 = vpop.f32.mrf.mxu0 }
 0x192   :  { %v1086_v3 = vadd.f32 %v2439_v5, %v849_v60 }
 0x193   :  { %v1079_v11 = vpop.f32.mrf.mxu0 }
 0x194   :  { %v1080_v24 = vadd.f32 %v1079_v11, %v841_v47 }
 0x195   :  { %v2442_v12 = vpop.f32.mrf.mxu0 }
 0x196   :  { %v1098_v23 = vadd.f32 %v2442_v12, %v865_v8  ;;  %v873_v12 = vadd.f32 %v872_v6, %v675_v14 }
 0x197   :  { %v1091_v0 = vpop.f32.mrf.mxu0 }
 0x199   :  { %v2445_v2 = vpop.f32.mrf.mxu0  ;;  %v2495_v13 = vpop.f32.mrf.mxu1 }
 0x19a   :  { %v1263_v39 = vadd.f32 %v2495_v13, %v1086_v3  ;;  %v1092_v3 = vadd.f32 %v1091_v0, %v857_v22  ;;  %v1110_v32 = vadd.f32 %v2445_v2, %v881_v59  ;;  %v507_v0 = vadd.f32 %v3384_v56, %v3374_v15 }
 0x19b   :  { %v1103_v30 = vpop.f32.mrf.mxu0  ;;  %v1256_v53 = vpop.f32.mrf.mxu1  ;;  %v501_v15 = vadd.f32 %v3388_v7, %v3378_v40  ;;  %v519_v2 = vadd.f32 %v3394_v49, %v3382_v48 }
 0x19c   :  { %v1351_v45 = vmul.f32 14.285714, %v1263_v39  ;;  %v1257_v60 = vadd.f32 %v1256_v53, %v1080_v24  ;;  %v1104_v42 = vadd.f32 %v1103_v30, %v873_v12  ;;  %v710_v56 = vadd.f32 %v3446_v19, %v507_v0  ;;  %v4232_v0 = vld [vmem:[#allocation18_spill] sm:$0xff] }
 0x19d   :  { %v2448_v1 = vpop.f32.mrf.mxu0  ;;  %v2498_v11 = vpop.f32.mrf.mxu1  ;;  %v703_v13 = vadd.f32 %v3450_v25, %v501_v15  ;;  %v724_v30 = vadd.f32 %v3454_v61, %v519_v2 }
 0x19e   :  { %v1350_v5 = vmul.f32 14.285714, %v1257_v60  ;;  %v1275_v58 = vadd.f32 %v2498_v11, %v1098_v23  ;;  %v3499_v46 = vsel %vm1403_vm3, %v1351_v45, -1e+30  ;;  %v1122_v51 = vadd.f32 %v2448_v1, %v897_v54  ;;  %v4226_v11 = vld [vmem:[#allocation22_spill] sm:$0xff]  ;;  %v4233_v54 = vld [vmem:[#allocation23_spill] sm:$0xff] }
 0x19f   :  { %v1268_v24 = vpop.f32.mrf.mxu1  ;;  %1589 = vmax.xlane.f32.xlu0 %v3499_v46  ;;  %v1115_v33 = vpop.f32.mrf.mxu0  ;;  %v913_v4 = vadd.f32 %v3456_v21, %v710_v56  ;;  %v905_v48 = vadd.f32 %v3460_v29, %v703_v13  ;;  %v531_v23 = vadd.f32 %v3404_v43, %v3392_v36  ;;  %v717_v45 = vadd.f32 %v3458_v9, %v513_v17  ;;  %v4228_v36 = vld [vmem:[#allocation17_spill] sm:$0xff]  ;;  %v4229_v9 = vld [vmem:[#allocation19_spill] sm:$0xff]  ;;  %v4239_v17 = vld [vmem:[#allocation30_spill] sm:$0xff] }
 0x1a0   :  { %v1353_v27 = vmul.f32 14.285714, %v1275_v58  ;;  %v1269_v37 = vadd.f32 %v1268_v24, %v1092_v3  ;;  %v3514_v16 = vsel %vm1403_vm3, %v1350_v5, -1e+30  ;;  %v1116_v40 = vadd.f32 %v1115_v33, %v889_v52  ;;  %v4227_v3 = vld [vmem:[#allocation9_spill] sm:$0xff]  ;;  %v4237_v13 = vld [vmem:[#allocation27_spill] sm:$0xff] }
 0x1a1   :  { %v2451_v50 = vpop.f32.mrf.mxu0  ;;  %v2501_v57 = vpop.f32.mrf.mxu1  ;;  %v929_v31 = vadd.f32 %v4225_v62, %v724_v30  ;;  %v525_v5 = vadd.f32 %v4227_v3, %v4226_v11  ;;  %v738_v43 = vadd.f32 %v4228_v36, %v531_v23  ;;  %v921_v58 = vadd.f32 %v4229_v9, %v717_v45 }
 0x1a2   :  { %v1352_v18 = vmul.f32 14.285714, %v1269_v37  ;;  %v1287_v41 = vadd.f32 %v2501_v57, %v1110_v32  ;;  %v3510_v63 = vsel %vm1403_vm3, %v1353_v27, -1e+30  ;;  %v1134_v21 = vadd.f32 %v2451_v50, %v913_v4  ;;  %v4230_v32 = vld [vmem:[#allocation26_spill] sm:$0xff]  ;;  %v4231_v27 = vld [vmem:[#allocation31_spill] sm:$0xff] }
 0x1a3   :  { %v1280_v6 = vpop.f32.mrf.mxu1  ;;  %1593 = vmax.xlane.f32.xlu1 %v3510_v63  ;;  %v1127_v35 = vpop.f32.mrf.mxu0  ;;  %1587 = vmax.xlane.f32.xlu0 %v3514_v16  ;;  %v543_v37 = vadd.f32 %v4231_v27, %v4230_v32  ;;  %v731_v34 = vadd.f32 %v4232_v0, %v525_v5  ;;  %v1450_v32 = vld [vmem:[%s4058_s0 + $0x60] sm:$0xff] }
 0x1a4   :  { %v1281_v47 = vadd.f32 %v1280_v6, %v1104_v42  ;;  %v1355_v8 = vmul.f32 14.285714, %v1287_v41  ;;  %v3528_v10 = vsel %vm1403_vm3, %v1352_v18, -1e+30  ;;  %v1128_v61 = vadd.f32 %v1127_v35, %v905_v48  ;;  %v4234_v6 = vld [vmem:[#allocation24_spill] sm:$0xff]  ;;  %v4235_v35 = vld [vmem:[#allocation11_spill] sm:$0xff]  ;;  %v3620_v27 = vpop.permute.xlu0 %1456 }
 0x1a5   :  { %v2454_v7 = vpop.f32.mrf.mxu0  ;;  %v2504_v19 = vpop.f32.mrf.mxu1  ;;  %v945_v42 = vadd.f32 %v4233_v54, %v738_v43  ;;  %v937_v4 = vadd.f32 %v4237_v13, %v731_v34 }
 0x1a6   :  { %v1354_v44 = vmul.f32 14.285714, %v1281_v47  ;;  %v1299_v39 = vadd.f32 %v2504_v19, %v1122_v51  ;;  %v3546_v1 = vsel %vm1403_vm3, %v1355_v8, -1e+30  ;;  %v1146_v12 = vadd.f32 %v2454_v7, %v929_v31  ;;  %v4236_v47 = vld [vmem:[#allocation21_spill] sm:$0xff]  ;;  %v3628_v54 = vpop.permute.xlu1 %1489 }
 0x1a7   :  { %v1139_v49 = vpop.f32.mrf.mxu0  ;;  %v1292_v25 = vpop.f32.mrf.mxu1  ;;  %1591 = vmax.xlane.f32.xlu1 %v3528_v10  ;;  %v537_v51 = vadd.f32 %v4235_v35, %v4234_v6  ;;  %v752_v2 = vadd.f32 %v4236_v47, %v543_v37 }
 0x1a8   :  { %v1293_v53 = vadd.f32 %v1292_v25, %v1116_v40  ;;  %v3537_v22 = vsel %vm1403_vm3, %v1354_v44, -1e+30  ;;  %v1357_v28 = vmul.f32 14.285714, %v1299_v39  ;;  %v1140_v50 = vadd.f32 %v1139_v49, %v921_v58  ;;  %v4238_v44 = vld [vmem:[#allocation25_spill] sm:$0xff]  ;;  %v3622_v37 = vpop.permute.xlu0 %1462 }
 0x1a9   :  { %v2457_v60 = vpop.f32.mrf.mxu0  ;;  %v2507_v29 = vpop.f32.mrf.mxu1  ;;  %1595 = vmax.xlane.f32.xlu0 %v3537_v22  ;;  %v745_v39 = vadd.f32 %v4238_v44, %v537_v51  ;;  %v961_v30 = vadd.f32 %v4239_v17, %v752_v2 }
 0x1aa   :  { %v1356_v14 = vmul.f32 14.285714, %v1293_v53  ;;  %v1311_v59 = vadd.f32 %v2507_v29, %v1134_v21  ;;  %v3564_v52 = vsel %vm1403_vm3, %v1357_v28, -1e+30  ;;  %v1158_v7 = vadd.f32 %v2457_v60, %v945_v42 }
 0x1ab   :  { %v1151_v38 = vpop.f32.mrf.mxu0  ;;  %v1304_v55 = vpop.f32.mrf.mxu1  ;;  %1597 = vmax.xlane.f32.xlu1 %v3546_v1  ;;  %v953_v62 = vadd.f32 %v3486_v20, %v745_v39 }
 0x1ac   :  { %v1305_v24 = vadd.f32 %v1304_v55, %v1128_v61  ;;  %v3555_v33 = vsel %vm1403_vm3, %v1356_v14, -1e+30  ;;  %v1359_v18 = vmul.f32 14.285714, %v1311_v59  ;;  %v1152_v48 = vadd.f32 %v1151_v38, %v937_v4  ;;  %v3624_v0 = vpop.permute.xlu0 %1480  ;;  %v4240_v4 = vld [vmem:[#allocation10_spill] sm:$0xff] }
 0x1ad   :  { %v2510_v57 = vpop.f32.mrf.mxu1  ;;  %1599 = vmax.xlane.f32.xlu0 %v3555_v33  ;;  %v2460_v15 = vpop.f32.mrf.mxu0  ;;  %vm1404_vm5 = vcmp.ne.s32.totalorder %v3427_v26, %v4240_v4 }
 0x1ae   :  { %v1358_v41 = vmul.f32 14.285714, %v1305_v24  ;;  %v1323_v56 = vadd.f32 %v2510_v57, %v1146_v12  ;;  %v3580_v45 = vsel %vm1403_vm3, %v1359_v18, -1e+30  ;;  %v1170_v61 = vadd.f32 %v2460_v15, %v961_v30  ;;  %v1451_v24 = vld [vmem:[%s4058_s0 + $0x68] sm:$0xff] }
 0x1af   :  { %v1316_v40 = vpop.f32.mrf.mxu1  ;;  %1601 = vmax.xlane.f32.xlu1 %v3564_v52  ;;  %v1163_v21 = vpop.f32.mrf.mxu0 }
 0x1b0   :  { %v1317_v19 = vadd.f32 %v1316_v40, %v1140_v50  ;;  %v3573_v8 = vsel %vm1403_vm3, %v1358_v41, -1e+30  ;;  %v1361_v25 = vmul.f32 14.285714, %v1323_v56  ;;  %v1164_v28 = vadd.f32 %v1163_v21, %v953_v62  ;;  %v3626_v34 = vpop.permute.xlu0 %1486 }
 0x1b1   :  { %v2513_v49 = vpop.f32.mrf.mxu1  ;;  %1603 = vmax.xlane.f32.xlu0 %v3573_v8  ;;  %v3683_v62 = vadd.s32 16, %v4240_v4 }
 0x1b2   :  { %v1360_v53 = vmul.f32 14.285714, %v1317_v19  ;;  %v1335_v23 = vadd.f32 %v2513_v49, %v1158_v7  ;;  %v3591_v5 = vsel %vm1403_vm3, %v1361_v25, -1e+30 }
 0x1b3   :  { %v1328_v31 = vpop.f32.mrf.mxu1  ;;  %1605 = vmax.xlane.f32.xlu1 %v3580_v45  ;;  %vm1406_vm7 = vcmp.ne.s32.totalorder %v3427_v26, %v3683_v62 }
 0x1b4   :  { %v1329_v60 = vadd.f32 %v1328_v31, %v1152_v48  ;;  %v3586_v29 = vsel %vm1403_vm3, %v1360_v53, -1e+30  ;;  %v1363_v59 = vmul.f32 14.285714, %v1335_v23  ;;  %v3666_v48 = vadd.s32 24, %v4240_v4 }
 0x1b5   :  { %v2516_v14 = vpop.f32.mrf.mxu1  ;;  %1607 = vmax.xlane.f32.xlu0 %v3586_v29 }
 0x1b6   :  { %v1362_v11 = vmul.f32 14.285714, %v1329_v60  ;;  %v1347_v3 = vadd.f32 %v2516_v14, %v1170_v61  ;;  %v3601_v38 = vsel %vm1403_vm3, %v1363_v59, -1e+30  ;;  %vm1407_vm6 = vcmp.ne.s32.totalorder %v3427_v26, %v3666_v48 }
 0x1b7   :  { %v1340_v20 = vpop.f32.mrf.mxu1  ;;  %1609 = vmax.xlane.f32.xlu1 %v3591_v5  ;;  %v3694_v59 = vadd.s32 40, %v4240_v4 }
 0x1b8   :  { %v1341_v36 = vadd.f32 %v1340_v20, %v1164_v28  ;;  %v3596_v43 = vsel %vm1403_vm3, %v1362_v11, -1e+30  ;;  %v1365_v9 = vmul.f32 14.285714, %v1347_v3 }
 0x1b9   :  { %1611 = vmax.xlane.f32.xlu0 %v3596_v43  ;;  %vm1409_vm8 = vcmp.ne.s32.totalorder %v3427_v26, %v3694_v59 }
 0x1ba   :  { %v1364_v58 = vmul.f32 14.285714, %v1341_v36  ;;  %v3611_v12 = vsel %vm1403_vm3, %v1365_v9, -1e+30  ;;  %v3706_v36 = vadd.s32 32, %v4240_v4 }
 0x1bb   :  { %1613 = vmax.xlane.f32.xlu1 %v3601_v38 }
 0x1bc   :  { %v3606_v55 = vsel %vm1403_vm3, %v1364_v58, -1e+30  ;;  %vm4129_vm9 = vcmp.ne.s32.totalorder %v3427_v26, %v3706_v36 }
 0x1bd   :  { %1615 = vmax.xlane.f32.xlu0 %v3606_v55 }
 0x1bf   :  { %1617 = vmax.xlane.f32.xlu1 %v3611_v12 }
 0x1d0   :  { %1495 = vperm.xlu1 %2524, %v1451_v24  }
 0x1d3   :  { %1492 = vperm.xlu0 %2523, %v1450_v32  }
 0x228   :  { %v1590_v42 = vpop.xlane.xlu0 %1589 }
 0x229   :  { %v3631_v50 = vsub.f32 %v3499_v46, %v1590_v42  ;;  %v3718_v42 = vadd.s32 88, %v4240_v4 }
 0x22b   :  { %v1637_v57 = vmul.f32 1.442695, %v3631_v50  ;;  %vm1415_vm10 = vcmp.ne.s32.totalorder %v3427_v26, %v3718_v42  ;;  %v4248_v42 = vld [vmem:[#allocation28_spill] sm:$0xff] }
 0x22c   :  { %v1594_v18 = vpop.xlane.xlu1 %1593  ;;  %v1588_v41 = vpop.xlane.xlu0 %1587 }
 0x22d   :  { %2525 = vpow2.f32 %v1637_v57  ;;  %v3635_v15 = vsub.f32 %v3510_v63, %v1594_v18  ;;  %v3638_v56 = vsub.f32 %v3514_v16, %v1588_v41  ;;  %v3650_v16 = vadd.s32 8, %v4240_v4 }
 0x22e   :  { %v3723_v57 = vadd.s32 56, %v4240_v4 }
 0x22f   :  { %v1635_v6 = vmul.f32 1.442695, %v3638_v56  ;;  %v1641_v35 = vmul.f32 1.442695, %v3635_v15  ;;  %vm1405_vm4 = vcmp.ne.s32.totalorder %v3427_v26, %v3650_v16 }
 0x230   :  { %v1592_v51 = vpop.xlane.xlu1 %1591  ;;  %vm1411_vm11 = vcmp.ne.s32.totalorder %v3427_v26, %v3723_v57 }
 0x231   :  { %v3643_v47 = vsub.f32 %v3528_v10, %v1592_v51  ;;  %2527 = vpow2.f32 %v1635_v6 }
 0x232   :  { %2529 = vpow2.f32 %v1641_v35  ;;  %v1596_v13 = vpop.xlane.xlu0 %1595 }
 0x233   :  { %v1639_v46 = vmul.f32 1.442695, %v3643_v47  ;;  %v3653_v40 = vsub.f32 %v3537_v22, %v1596_v13 }
 0x234   :  { %v1598_v2 = vpop.xlane.xlu1 %1597 }
 0x235   :  { %v3647_v63 = vsub.f32 %v3546_v1, %v1598_v2  ;;  %2531 = vpow2.f32 %v1639_v46  ;;  %v1643_v1 = vmul.f32 1.442695, %v3653_v40  ;;  %v3735_v46 = vadd.s32 48, %v4240_v4 }
 0x236   :  { %v1600_v17 = vpop.xlane.xlu0 %1599 }
 0x237   :  { %v1645_v7 = vmul.f32 1.442695, %v3647_v63  ;;  %v3671_v49 = vsub.f32 %v3555_v33, %v1600_v17  ;;  %vm4127_vm12 = vcmp.ne.s32.totalorder %v3427_v26, %v3735_v46 }
 0x238   :  { %v1602_v10 = vpop.xlane.xlu1 %1601 }
 0x239   :  { %2533 = vpow2.f32 %v1645_v7  ;;  %v3663_v39 = vsub.f32 %v3564_v52, %v1602_v10  ;;  %v1647_v61 = vmul.f32 1.442695, %v3671_v49 }
 0x23a   :  { %v2526_v19 = vpop.eup %2525  ;;  %2535 = vpow2.f32 %v1643_v1  ;;  %v1604_v33 = vpop.xlane.xlu0 %1603 }
 0x23b   :  { %v1668_v44 = vsel %vm1405_vm4, %v2526_v19, 0.0  ;;  %v1649_v25 = vmul.f32 1.442695, %v3663_v39  ;;  %v3699_v11 = vsub.f32 %v3573_v8, %v1604_v33  ;;  %v3771_v33 = vadd.s32 80, %v4240_v4 }
 0x23c   :  { %1685 = vadd.xlane.f32.xlu1 %v1668_v44  ;;  %v1606_v22 = vpop.xlane.xlu1 %1605 }
 0x23d   :  { %2537 = vpow2.f32 %v1649_v25  ;;  %v3688_v60 = vsub.f32 %v3580_v45, %v1606_v22  ;;  %v1651_v9 = vmul.f32 1.442695, %v3699_v11  ;;  %vm4123_vm14 = vcmp.ne.s32.totalorder %v3427_v26, %v3771_v33 }
 0x23e   :  { %v2528_v30 = vpop.eup %2527  ;;  %v1608_v20 = vpop.xlane.xlu0 %1607 }
 0x23f   :  { %v1667_v52 = vsel %vm1404_vm5, %v2528_v30, 0.0  ;;  %v2530_v53 = vpop.eup %2529  ;;  %v1653_v45 = vmul.f32 1.442695, %v3688_v60  ;;  %v3712_v8 = vsub.f32 %v3586_v29, %v1608_v20  ;;  %v3759_v30 = vadd.s32 64, %v4240_v4 }
 0x240   :  { %v1610_v21 = vpop.xlane.xlu1 %1609  ;;  %1683 = vadd.xlane.f32.xlu1 %v1667_v52  ;;  %v1670_v28 = vsel %vm1407_vm6, %v2530_v53, 0.0 }
 0x241   :  { %v3678_v23 = vsub.f32 %v3591_v5, %v1610_v21  ;;  %v1655_v29 = vmul.f32 1.442695, %v3712_v8  ;;  %vm4125_vm13 = vcmp.ne.s32.totalorder %v3427_v26, %v3759_v30 }
 0x242   :  { %v2532_v14 = vpop.eup %2531  ;;  %v1612_v35 = vpop.xlane.xlu0 %1611 }
 0x243   :  { %v1657_v31 = vmul.f32 1.442695, %v3678_v23  ;;  %v1669_v3 = vsel %vm1406_vm7, %v2532_v14, 0.0  ;;  %v3743_v2 = vsub.f32 %v3596_v43, %v1612_v35 }
 0x244   :  { %1689 = vadd.xlane.f32.xlu1 %v1670_v28  ;;  %v1614_v32 = vpop.xlane.xlu1 %1613  ;;  %v1381_v28 = vadd.s32 104, %v4240_v4 }
 0x245   :  { %2539 = vpow2.f32 %v1657_v31  ;;  %v3727_v18 = vsub.f32 %v3601_v38, %v1614_v32  ;;  %v1659_v44 = vmul.f32 1.442695, %v3743_v2 }
 0x246   :  { %2541 = vpow2.f32 %v1647_v61  ;;  %v2534_v5 = vpop.eup %2533  ;;  %v1616_v17 = vpop.xlane.xlu0 %1615  ;;  %vm1417_vm15 = vcmp.ne.s32.totalorder %v3427_v26, %v1381_v28 }
 0x247   :  { %2543 = vpow2.f32 %v1653_v45  ;;  %v1672_v58 = vsel %vm1409_vm8, %v2534_v5, 0.0  ;;  %v2536_v24 = vpop.eup %2535  ;;  %v1661_v13 = vmul.f32 1.442695, %v3727_v18  ;;  %v3762_v25 = vsub.f32 %v3606_v55, %v1616_v17  ;;  %v1452_v5 = vld [vmem:[%s4058_s0 + $0x70] sm:$0xff]  ;;  %v4250_v17 = vld [vmem:[#allocation32_spill] sm:$0xff] }
 0x248   :  { %1687 = vadd.xlane.f32.xlu1 %v1669_v3  ;;  %2545 = vpow2.f32 %v1651_v9  ;;  %v1671_v41 = vsel %vm4129_vm9, %v2536_v24, 0.0  ;;  %v1618_v19 = vpop.xlane.xlu1 %1617  ;;  %v3785_v3 = vadd.s32 96, %v4240_v4 }
 0x249   :  { %2547 = vpow2.f32 %v1655_v29  ;;  %v3753_v1 = vsub.f32 %v3611_v12, %v1618_v19  ;;  %v1663_v31 = vmul.f32 1.442695, %v3762_v25  ;;  %v3803_v29 = vadd.s32 112, %v4240_v4 }
 0x24a   :  { %v2538_v6 = vpop.eup %2537  ;;  %2549 = vpow2.f32 %v1661_v13 }
 0x24b   :  { %v1674_v7 = vsel %vm1411_vm11, %v2538_v6, 0.0  ;;  %2551 = vpow2.f32 %v1659_v44  ;;  %v1665_v21 = vmul.f32 1.442695, %v3753_v1 }
 0x24c   :  { %1693 = vadd.xlane.f32.xlu1 %v1672_v58  ;;  %v3793_v58 = vadd.s32 120, %v4240_v4  ;;  %v2669_v4 = vmov 0.0   ;;  %v1496_v59 = vpop.permute.xlu1 %1495 }
 0x24d   :  { %2553 = vpow2.f32 %v1665_v21 }
 0x24e   :  { %2555 = vpow2.f32 %v1663_v31  ;;  %vm4126_vm1 = vcmp.ne.s32.totalorder %v3427_v26, %v3793_v58  ;;  %v1493_v21 = vpop.permute.xlu0 %1492 }
 0x250   :  { %1691 = vadd.xlane.f32.xlu1 %v1671_v41 }
 0x252   :  { %v2540_v51 = vpop.eup %2539 }
 0x253   :  { %v1678_v38 = vsel %vm1415_vm10, %v2540_v51, 0.0  ;;  %v2542_v10 = vpop.eup %2541  ;;  %v4242_v51 = vld [vmem:[#allocation15_spill] sm:$0xff] }
 0x254   :  { %1705 = vadd.xlane.f32.xlu0 %v1678_v38  ;;  %1697 = vadd.xlane.f32.xlu1 %v1674_v7  ;;  %v1673_v43 = vsel %vm4127_vm12, %v2542_v10, 0.0  ;;  %v2544_v22 = vpop.eup %2543  ;;  %v1453_v38 = vld [vmem:[%s4058_s0 + $0x78] sm:$0xff]  ;;  %v4245_v7 = vld [vmem:[#allocation14_spill] sm:$0xff]  ;;  %s2670_s0 = smov [#allocation5]  }
 0x255   :  { %v1676_v12 = vsel %vm1413_vm0, %v2544_v22, 0.0  ;;  %v2546_v53 = vpop.eup %2545  ;;  %vm4124_vm0 = vcmp.ne.s32.totalorder %v3427_v26, %v3785_v3  ;;  %s1960_s8 = sshll.u32 %s2670_s0, 4  ;;  %s1961_s8 = int_to_ptr.vmem [resolvable:$true] %s1960_s8 }
 0x256   :  { %v1675_v55 = vsel %vm4125_vm13, %v2546_v53, 0.0  ;;  %v2548_v61 = vpop.eup %2547  ;;  %s2641_s9 = scalar_lea.vmem %s1961_s8, 2048  ;;  %p2646_p6 = scmp.lt.s32.totalorder %s1961_s8, %s1961_s8 }
 0x257   :  { %v1677_v14 = vsel %vm4123_vm14, %v2548_v61, 0.0  ;;  %v2550_v45 = vpop.eup %2549  ;;  %vm4128_vm14 = vcmp.ne.s32.totalorder %v3427_v26, %v3803_v29  ;;  %p2642_p5 = scmp.ne.s32.totalorder %s1961_s8, %s2641_s9  ;;  %p2647_p7 = scmp.lt.s32.totalorder %s2641_s9, %s2641_s9 }
 0x258   :  { %1695 = vadd.xlane.f32.xlu1 %v1673_v43  ;;  %v1680_v20 = vsel %vm1417_vm15, %v2550_v45, 0.0  ;;  %v2552_v9 = vpop.eup %2551 }
 0x259   :  { %v1679_v24 = vsel %vm4124_vm0, %v2552_v9, 0.0  ;;  %vm1507_vm0 = vcmp.eq.s32.totalorder %v3620_v27, %v4242_v51  ;;  %v4243_v27 = vld [vmem:[#allocation8_spill] sm:$0xff]  ;;  %p2648_p8 = por %p2647_p7, %p2646_p6 }
 0x25a   :  { %v2554_v32 = vpop.eup %2553  ;;  %vm1523_vm13 = vmand %vm1507_vm0, %vm1404_vm5  ;;  %vm1510_vm9 = vcmp.eq.s32.totalorder %v4243_v27, %v4242_v51 }
 0x25b   :  { %v1682_v41 = vsel %vm4126_vm1, %v2554_v32, 0.0  ;;  %v2556_v6 = vpop.eup %2555  ;;  %vm1509_vm1 = vcmp.eq.s32.totalorder %v3622_v37, %v4242_v51  ;;  %vm1539_vm12 = vmand %vm1523_vm13, %vm1403_vm3  ;;  %v4244_v37 = vld [vmem:[#allocation29_spill] sm:$0xff]  ;;  %p2649_p9 = pnand %p2648_p8, %p2642_p5 }
 0x25c   :  { %1701 = vadd.xlane.f32.xlu1 %v1676_v12  ;;  %v1681_v35 = vsel %vm4128_vm14, %v2556_v6, 0.0  ;;  %vm1525_vm14 = vmand %vm1509_vm1, %vm1406_vm7  ;;  %v3831_v13 = vsel %vm1539_vm12, 1.0, %v2669_v4  ;;  %vm1512_vm7 = vcmp.eq.s32.totalorder %v4244_v37, %v4242_v51  ;;  %vm1518_vm1 = vcmp.eq.s32.totalorder %v3628_v54, %v4242_v51  ;;  %v4247_v54 = vld [vmem:[#allocation20_spill] sm:$0xff] }
 0x25d   :  { %vm1541_vm5 = vmand %vm1525_vm14, %vm1403_vm3  ;;  %vm1514_vm14 = vcmp.eq.s32.totalorder %v4245_v7, %v4242_v51 }
 0x25e   :  { %vm1526_vm13 = vmand %vm1510_vm9, %vm1407_vm6  ;;  %v3842_v62 = vsel %vm1541_vm5, 1.0, %v2669_v4 }
 0x25f   :  { %vm1542_vm12 = vmand %vm1526_vm13, %vm1403_vm3  ;;  %vm1520_vm13 = vcmp.eq.s32.totalorder %v1496_v59, %v4242_v51 }
 0x260   :  { %1699 = vadd.xlane.f32.xlu1 %v1675_v55  ;;  %vm1528_vm0 = vmand %vm1512_vm7, %vm1409_vm8  ;;  %v3853_v48 = vsel %vm1542_vm12, 1.0, %v2669_v4 }
 0x261   :  { %vm1544_vm6 = vmand %vm1528_vm0, %vm1403_vm3 }
 0x262   :  { %vm1530_vm9 = vmand %vm1514_vm14, %vm1411_vm11  ;;  %v3862_v10 = vsel %vm1544_vm6, 1.0, %v2669_v4  ;;  %vm1511_vm14 = vcmp.eq.s32.totalorder %v4248_v42, %v4242_v51  ;;  %vm4249_vm6 = vcmp.ne.s32.totalorder %v3427_v26, %v3706_v36 }
 0x263   :  { %vm1546_vm8 = vmand %vm1530_vm9, %vm1403_vm3 }
 0x264   :  { %1703 = vadd.xlane.f32.xlu1 %v1677_v14  ;;  %v3870_v19 = vsel %vm1546_vm8, 1.0, %v2669_v4  ;;  %vm1548_vm11 = vmand %vm3440_vm2, %vm1403_vm3  ;;  %vm1508_vm2 = vcmp.eq.s32.totalorder %v4247_v54, %v4242_v51  ;;  %vm1513_vm8 = vcmp.eq.s32.totalorder %v4250_v17, %v4242_v51 }
 0x265   :  { %vm1534_vm5 = vmand %vm1518_vm1, %vm1415_vm10  ;;  %v3882_v44 = vsel %vm1548_vm11, 1.0, %v2669_v4  ;;  %vm4251_vm1 = vcmp.ne.s32.totalorder %v3427_v26, %v3735_v46 }
 0x266   :  { %vm1550_vm7 = vmand %vm1534_vm5, %vm1403_vm3  ;;  %vm1515_vm5 = vcmp.eq.s32.totalorder %v3624_v0, %v4242_v51 }
 0x267   :  { %vm1536_vm12 = vmand %vm1520_vm13, %vm1417_vm15  ;;  %v3892_v43 = vsel %vm1550_vm7, 1.0, %v2669_v4  ;;  %vm4252_vm7 = vcmp.ne.s32.totalorder %v3427_v26, %v3759_v30 }
 0x268   :  { %1709 = vadd.xlane.f32.xlu1 %v1680_v20  ;;  %vm1552_vm10 = vmand %vm1536_vm12, %vm1403_vm3 }
 0x269   :  { %vm1524_vm0 = vmand %vm1508_vm2, %vm1405_vm4  ;;  %v3903_v22 = vsel %vm1552_vm10, 1.0, %v2669_v4  ;;  %vm1517_vm2 = vcmp.eq.s32.totalorder %v3626_v34, %v4242_v51 }
 0x26a   :  { %1498 = vperm.xlu0 %2523, %v1452_v5   ;;  %vm1540_vm15 = vmand %vm1524_vm0, %vm1403_vm3  ;;  %vm4253_vm0 = vcmp.ne.s32.totalorder %v3427_v26, %v3771_v33 }
 0x26b   :  { %vm1527_vm9 = vmand %vm1511_vm14, %vm4249_vm6  ;;  %v3914_v16 = vsel %vm1540_vm15, 1.0, %v2669_v4  ;;  %vm1519_vm15 = vcmp.eq.s32.totalorder %v1493_v21, %v4242_v51 }
 0x26c   :  { %1707 = vadd.xlane.f32.xlu1 %v1679_v24  ;;  %vm1543_vm4 = vmand %vm1527_vm9, %vm1403_vm3  ;;  %vm4254_vm9 = vcmp.ne.s32.totalorder %v3427_v26, %v3785_v3 }
 0x26d   :  { %vm1529_vm11 = vmand %vm1513_vm8, %vm4251_vm1  ;;  %v1977_v36 = vsel %vm1543_vm4, 1.0, %v2669_v4 }
 0x26e   :  { %vm1545_vm13 = vmand %vm1529_vm11, %vm1403_vm3  ;;  %vm4255_vm11 = vcmp.ne.s32.totalorder %v3427_v26, %v3803_v29 }
 0x26f   :  { %vm1531_vm12 = vmand %vm1515_vm5, %vm4252_vm7  ;;  %v1979_v46 = vsel %vm1545_vm13, 1.0, %v2669_v4 }
 0x270   :  { %1713 = vadd.xlane.f32.xlu1 %v1682_v41  ;;  %vm1547_vm10 = vmand %vm1531_vm12, %vm1403_vm3  ;;  %vm4256_vm12 = vcmp.ne.s32.totalorder %v3427_v26, %v3793_v58 }
 0x271   :  { %vm1533_vm14 = vmand %vm1517_vm2, %vm4253_vm0  ;;  %v3940_v0 = vsel %vm1547_vm10, 1.0, %v2669_v4 }
 0x272   :  { %vm1549_vm6 = vmand %vm1533_vm14, %vm1403_vm3 }
 0x273   :  { %vm1535_vm8 = vmand %vm1519_vm15, %vm4254_vm9  ;;  %v3949_v34 = vsel %vm1549_vm6, 1.0, %v2669_v4 }
 0x274   :  { %1711 = vadd.xlane.f32.xlu1 %v1681_v35  ;;  %vm1551_vm4 = vmand %vm1535_vm8, %vm1403_vm3 }
 0x275   :  { %v3955_v30 = vsel %vm1551_vm4, 1.0, %v2669_v4 }
 0x285   :  { %1501 = vperm.xlu1 %2524, %v1453_v38  }
 0x289   :  { %1811 = vadd.xlane.f32.xlu0 %v3831_v13 }
 0x28d   :  { %1815 = vadd.xlane.f32.xlu0 %v3842_v62 }
 0x291   :  { %1817 = vadd.xlane.f32.xlu0 %v3853_v48 }
 0x295   :  { %1821 = vadd.xlane.f32.xlu0 %v3862_v10 }
 0x299   :  { %1825 = vadd.xlane.f32.xlu0 %v3870_v19 }
 0x29d   :  { %1829 = vadd.xlane.f32.xlu0 %v3882_v44 }
 0x2a1   :  { %1833 = vadd.xlane.f32.xlu0 %v3892_v43 }
 0x2a5   :  { %1837 = vadd.xlane.f32.xlu0 %v3903_v22 }
 0x2a9   :  { %1813 = vadd.xlane.f32.xlu1 %v3914_v16 }
 0x2ad   :  { %1819 = vadd.xlane.f32.xlu1 %v1977_v36 }
 0x2b1   :  { %1823 = vadd.xlane.f32.xlu1 %v1979_v46 }
 0x2b5   :  { %1827 = vadd.xlane.f32.xlu1 %v3940_v0 }
 0x2b9   :  { %1831 = vadd.xlane.f32.xlu1 %v3949_v34 }
 0x2bd   :  { %1835 = vadd.xlane.f32.xlu1 %v3955_v30 }
 0x2c5   :  { %v1686_v52 = vpop.xlane.xlu1 %1685 }
 0x2c9   :  { %v1684_v12 = vpop.xlane.xlu1 %1683 }
 0x2ca   :  { %2557 = vlog2.f32 %v1684_v12 }
 0x2cd   :  { %v1690_v53 = vpop.xlane.xlu1 %1689 }
 0x2d1   :  { %v1688_v33 = vpop.xlane.xlu1 %1687 }
 0x2d2   :  { %2559 = vlog2.f32 %v1688_v33 }
 0x2d5   :  { %v1694_v31 = vpop.xlane.xlu1 %1693 }
 0x2d7   :  { %v2558_v28 = vpop.eup %2557 }
 0x2d8   :  { %v1716_v3 = vmul.f32 0.6931472, %v2558_v28 }
 0x2d9   :  { %v1692_v55 = vpop.xlane.xlu1 %1691 }
 0x2da   :  { %2561 = vlog2.f32 %v1692_v55  ;;  %v1747_v32 = vsub.f32 %v3638_v56, %v1716_v3 }
 0x2dc   :  { %v1763_v27 = vmul.f32 %v3831_v13, %v1747_v32 }
 0x2dd   :  { %v1698_v61 = vpop.xlane.xlu1 %1697  ;;  %v1706_v14 = vpop.xlane.xlu0 %1705 }
 0x2df   :  { %v2560_v5 = vpop.eup %2559 }
 0x2e0   :  { %v1720_v24 = vmul.f32 0.6931472, %v2560_v5 }
 0x2e1   :  { %v1696_v45 = vpop.xlane.xlu1 %1695 }
 0x2e2   :  { %2563 = vlog2.f32 %v1696_v45  ;;  %v1749_v29 = vsub.f32 %v3643_v47, %v1720_v24 }
 0x2e4   :  { %v1765_v59 = vmul.f32 %v3842_v62, %v1749_v29 }
 0x2e5   :  { %v1499_v20 = vpop.permute.xlu0 %1498  ;;  %v1702_v9 = vpop.xlane.xlu1 %1701 }
 0x2e6   :  { %vm1521_vm1 = vcmp.eq.s32.totalorder %v1499_v20, %v4242_v51 }
 0x2e7   :  { %vm1537_vm5 = vmand %vm1521_vm1, %vm4255_vm11  ;;  %v2562_v41 = vpop.eup %2561 }
 0x2e8   :  { %vm1553_vm13 = vmand %vm1537_vm5, %vm1403_vm3  ;;  %v1724_v38 = vmul.f32 0.6931472, %v2562_v41 }
 0x2e9   :  { %v3966_v6 = vsel %vm1553_vm13, 1.0, %v2669_v4  ;;  %v1700_v35 = vpop.xlane.xlu1 %1699 }
 0x2ea   :  { %1839 = vadd.xlane.f32.xlu1 %v3966_v6  ;;  %2565 = vlog2.f32 %v1700_v35  ;;  %v1751_v56 = vsub.f32 %v3653_v40, %v1724_v38 }
 0x2ec   :  { %v1767_v42 = vmul.f32 %v1977_v36, %v1751_v56 }
 0x2ed   :  { %v1704_v37 = vpop.xlane.xlu1 %1703 }
 0x2ee   :  { %1779 = vadd.xlane.f32.xlu1 %v1763_v27  ;;  %2567 = vlog2.f32 %v1704_v37 }
 0x2ef   :  { %v2564_v7 = vpop.eup %2563  ;;  %2569 = vlog2.f32 %v1686_v52 }
 0x2f0   :  { %v1728_v57 = vmul.f32 0.6931472, %v2564_v7  ;;  %2571 = vlog2.f32 %v1690_v53 }
 0x2f1   :  { %v1710_v54 = vpop.xlane.xlu1 %1709 }
 0x2f2   :  { %1783 = vadd.xlane.f32.xlu1 %v1765_v59  ;;  %v1753_v17 = vsub.f32 %v3671_v49, %v1728_v57 }
 0x2f4   :  { %v1769_v13 = vmul.f32 %v1979_v46, %v1753_v17 }
 0x2f5   :  { %v1708_v21 = vpop.xlane.xlu1 %1707 }
 0x2f6   :  { %1787 = vadd.xlane.f32.xlu1 %v1767_v42  ;;  %2573 = vlog2.f32 %v1708_v21 }
 0x2f7   :  { %v2566_v47 = vpop.eup %2565  ;;  %2575 = vlog2.f32 %v1694_v31 }
 0x2f8   :  { %v1732_v12 = vmul.f32 0.6931472, %v2566_v47  ;;  %2577 = vlog2.f32 %v1698_v61 }
 0x2f9   :  { %v1714_v33 = vpop.xlane.xlu1 %1713 }
 0x2fa   :  { %1791 = vadd.xlane.f32.xlu1 %v1769_v13  ;;  %v1755_v62 = vsub.f32 %v3699_v11, %v1732_v12 }
 0x2fb   :  { %v2568_v40 = vpop.eup %2567 }
 0x2fc   :  { %v1736_v52 = vmul.f32 0.6931472, %v2568_v40  ;;  %v1771_v55 = vmul.f32 %v3940_v0, %v1755_v62  ;;  %v2570_v53 = vpop.eup %2569 }
 0x2fd   :  { %v1712_v36 = vpop.xlane.xlu1 %1711  ;;  %v2572_v28 = vpop.eup %2571  ;;  %v1718_v45 = vmul.f32 0.6931472, %v2570_v53 }
 0x2fe   :  { %2579 = vlog2.f32 %v1712_v36  ;;  %1795 = vadd.xlane.f32.xlu1 %v1771_v55  ;;  %v1757_v49 = vsub.f32 %v3712_v8, %v1736_v52  ;;  %v1722_v61 = vmul.f32 0.6931472, %v2572_v28 }
 0x2ff   :  { %2581 = vlog2.f32 %v1702_v9  ;;  %v1748_v8 = vsub.f32 %v3631_v50, %v1718_v45 }
 0x300   :  { %v1773_v46 = vmul.f32 %v3949_v34, %v1757_v49  ;;  %2583 = vlog2.f32 %v1706_v14  ;;  %v1750_v5 = vsub.f32 %v3635_v15, %v1722_v61 }
 0x301   :  { %v1502_v31 = vpop.permute.xlu1 %1501  ;;  %2585 = vlog2.f32 %v1710_v54  ;;  %v1764_v58 = vmul.f32 %v3914_v16, %v1748_v8 }
 0x302   :  { %vm1522_vm7 = vcmp.eq.s32.totalorder %v1502_v31, %v4242_v51  ;;  %1799 = vadd.xlane.f32.xlu1 %v1773_v46  ;;  %v1766_v50 = vmul.f32 %v3853_v48, %v1750_v5  ;;  %2587 = vlog2.f32 %v1714_v33 }
 0x303   :  { %v2574_v11 = vpop.eup %2573  ;;  %vm1538_vm2 = vmand %vm1522_vm7, %vm4256_vm12 }
 0x304   :  { %v1740_v0 = vmul.f32 0.6931472, %v2574_v11  ;;  %vm1554_vm10 = vmand %vm1538_vm2, %vm1403_vm3  ;;  %v2576_v3 = vpop.eup %2575 }
 0x305   :  { %v1988_v34 = vsel %vm1554_vm10, 1.0, %v2669_v4  ;;  %v1726_v20 = vmul.f32 0.6931472, %v2576_v3  ;;  %v2578_v9 = vpop.eup %2577 }
 0x306   :  { %1841 = vadd.xlane.f32.xlu0 %v1988_v34  ;;  %v1759_v51 = vsub.f32 %v3743_v2, %v1740_v0  ;;  %v1730_v24 = vmul.f32 0.6931472, %v2578_v9 }
 0x307   :  { %v1752_v32 = vsub.f32 %v3647_v63, %v1726_v20 }
 0x308   :  { %v1775_v14 = vmul.f32 %v3955_v30, %v1759_v51  ;;  %v1754_v35 = vsub.f32 %v3663_v39, %v1730_v24 }
 0x309   :  { %v1768_v16 = vmul.f32 %v3862_v10, %v1752_v32 }
 0x30a   :  { %1781 = vadd.xlane.f32.xlu0 %v1764_v58  ;;  %1803 = vadd.xlane.f32.xlu1 %v1775_v14  ;;  %v1770_v27 = vmul.f32 %v3870_v19, %v1754_v35 }
 0x30b   :  { %v2580_v26 = vpop.eup %2579 }
 0x30c   :  { %v1744_v4 = vmul.f32 0.6931472, %v2580_v26  ;;  %v2582_v2 = vpop.eup %2581 }
 0x30d   :  { %v1734_v41 = vmul.f32 0.6931472, %v2582_v2  ;;  %v2584_v38 = vpop.eup %2583 }
 0x30e   :  { %1785 = vadd.xlane.f32.xlu0 %v1766_v50  ;;  %v1761_v15 = vsub.f32 %v3762_v25, %v1744_v4  ;;  %v1738_v48 = vmul.f32 0.6931472, %v2584_v38  ;;  %v2586_v63 = vpop.eup %2585 }
 0x30f   :  { %v1756_v29 = vsub.f32 %v3688_v60, %v1734_v41  ;;  %v1742_v37 = vmul.f32 0.6931472, %v2586_v63  ;;  %v2588_v10 = vpop.eup %2587 }
 0x310   :  { %v1777_v30 = vmul.f32 %v3966_v6, %v1761_v15  ;;  %v1758_v7 = vsub.f32 %v3678_v23, %v1738_v48  ;;  %v1746_v6 = vmul.f32 0.6931472, %v2588_v10 }
 0x311   :  { %v1772_v25 = vmul.f32 %v3882_v44, %v1756_v29  ;;  %v1760_v59 = vsub.f32 %v3727_v18, %v1742_v37 }
 0x312   :  { %1789 = vadd.xlane.f32.xlu0 %v1768_v16  ;;  %1807 = vadd.xlane.f32.xlu1 %v1777_v30  ;;  %v1774_v39 = vmul.f32 %v3892_v43, %v1758_v7  ;;  %v1762_v19 = vsub.f32 %v3753_v1, %v1746_v6  ;;  %v1812_v23 = vpop.xlane.xlu0 %1811 }
 0x313   :  { %v1776_v56 = vmul.f32 %v3903_v22, %v1760_v59  ;;  %v1859_v17 = vmax.f32 %v1812_v23, 1.0  ;;  %vm1843_vm3 = vcmp.gt.f32.partialorder %v1812_v23, 0.0 }
 0x314   :  { %v1778_v60 = vmul.f32 %v1988_v34, %v1762_v19 }
 0x315   :  { %2589 = vrcp.f32 %v1859_v17 }
 0x316   :  { %1793 = vadd.xlane.f32.xlu0 %v1770_v27  ;;  %v1816_v21 = vpop.xlane.xlu0 %1815 }
 0x317   :  { %v1861_v18 = vmax.f32 %v1816_v21, 1.0  ;;  %vm1845_vm0 = vcmp.gt.f32.partialorder %v1816_v21, 0.0 }
 0x319   :  { %2591 = vrcp.f32 %v1861_v18 }
 0x31a   :  { %1797 = vadd.xlane.f32.xlu0 %v1772_v25  ;;  %v4010_v22 = vpop.xlane.xlu0 %1817 }
 0x31b   :  { %v1862_v4 = vmax.f32 %v4010_v22, 1.0  ;;  %vm1846_vm1 = vcmp.gt.f32.partialorder %v4010_v22, 0.0 }
 0x31e   :  { %1801 = vadd.xlane.f32.xlu0 %v1774_v39  ;;  %v4016_v33 = vpop.xlane.xlu0 %1821 }
 0x31f   :  { %v1864_v16 = vmax.f32 %v4016_v33, 1.0  ;;  %vm1848_vm11 = vcmp.gt.f32.partialorder %v4016_v33, 0.0 }
 0x322   :  { %1805 = vadd.xlane.f32.xlu0 %v1776_v56  ;;  %v2590_v62 = vpop.eup %2589  ;;  %v4019_v53 = vpop.xlane.xlu0 %1825 }
 0x323   :  { %v1866_v37 = vmax.f32 %v4019_v53, 1.0  ;;  %vm1850_vm13 = vcmp.gt.f32.partialorder %v4019_v53, 0.0 }
 0x326   :  { %1809 = vadd.xlane.f32.xlu0 %v1778_v60  ;;  %v2592_v49 = vpop.eup %2591  ;;  %v4022_v3 = vpop.xlane.xlu0 %1829 }
 0x327   :  { %v1868_v39 = vmax.f32 %v4022_v3, 1.0  ;;  %vm1852_vm7 = vcmp.gt.f32.partialorder %v4022_v3, 0.0 }
 0x32a   :  { %v4026_v50 = vpop.xlane.xlu0 %1833 }
 0x32b   :  { %vm1854_vm12 = vcmp.gt.f32.partialorder %v4026_v50, 0.0 }
 0x32e   :  { %v4032_v48 = vpop.xlane.xlu0 %1837 }
 0x32f   :  { %vm1856_vm2 = vcmp.gt.f32.partialorder %v4032_v48, 0.0 }
 0x332   :  { %v4004_v57 = vpop.xlane.xlu1 %1813 }
 0x333   :  { %v1860_v51 = vmax.f32 %v4004_v57, 1.0  ;;  %vm1844_vm8 = vcmp.gt.f32.partialorder %v4004_v57, 0.0  ;;  %v1872_v57 = vmax.f32 %v4032_v48, 1.0 }
 0x336   :  { %v1820_v44 = vpop.xlane.xlu1 %1819 }
 0x337   :  { %v1863_v1 = vmax.f32 %v1820_v44, 1.0  ;;  %vm1847_vm14 = vcmp.gt.f32.partialorder %v1820_v44, 0.0 }
 0x339   :  { %2593 = vrcp.f32 %v1863_v1 }
 0x33a   :  { %v1824_v54 = vpop.xlane.xlu1 %1823 }
 0x33b   :  { %v1865_v13 = vmax.f32 %v1824_v54, 1.0  ;;  %vm1849_vm15 = vcmp.gt.f32.partialorder %v1824_v54, 0.0  ;;  %v1870_v54 = vmax.f32 %v4026_v50, 1.0 }
 0x33d   :  { %2595 = vrcp.f32 %v1865_v13 }
 0x33e   :  { %v4006_v42 = vpop.xlane.xlu1 %1827 }
 0x33f   :  { %v1867_v40 = vmax.f32 %v4006_v42, 1.0  ;;  %vm1851_vm6 = vcmp.gt.f32.partialorder %v4006_v42, 0.0 }
 0x341   :  { %2597 = vrcp.f32 %v1867_v40 }
 0x342   :  { %v4008_v43 = vpop.xlane.xlu1 %1831 }
 0x343   :  { %v1869_v28 = vmax.f32 %v4008_v43, 1.0  ;;  %vm1853_vm9 = vcmp.gt.f32.partialorder %v4008_v43, 0.0 }
 0x345   :  { %2599 = vrcp.f32 %v1869_v28 }
 0x346   :  { %v4012_v47 = vpop.xlane.xlu1 %1835  ;;  %v2594_v61 = vpop.eup %2593  ;;  %2601 = vrcp.f32 %v1860_v51 }
 0x347   :  { %v1871_v58 = vmax.f32 %v4012_v47, 1.0  ;;  %vm1855_vm4 = vcmp.gt.f32.partialorder %v4012_v47, 0.0 }
 0x349   :  { %2603 = vrcp.f32 %v1871_v58 }
 0x34a   :  { %v2596_v20 = vpop.eup %2595  ;;  %2605 = vrcp.f32 %v1862_v4 }
 0x34b   :  { %2607 = vrcp.f32 %v1864_v16 }
 0x34e   :  { %v2598_v2 = vpop.eup %2597 }
 0x352   :  { %v2600_v38 = vpop.eup %2599 }
 0x353   :  { %v2602_v6 = vpop.eup %2601 }
 0x356   :  { %v2604_v59 = vpop.eup %2603 }
 0x357   :  { %v2606_v17 = vpop.eup %2605 }
 0x358   :  { %v2608_v13 = vpop.eup %2607 }
 0x373   :  { %v4014_v12 = vpop.xlane.xlu1 %1839 }
 0x374   :  { %v1873_v30 = vmax.f32 %v4014_v12, 1.0  ;;  %vm1857_vm5 = vcmp.gt.f32.partialorder %v4014_v12, 0.0 }
 0x376   :  { %2609 = vrcp.f32 %v1873_v30 }
 0x377   :  { %v1780_v52 = vpop.xlane.xlu1 %1779  ;;  %2611 = vrcp.f32 %v1866_v37 }
 0x378   :  { %v1876_v55 = vmul.f32 %v2590_v62, %v1780_v52  ;;  %2613 = vrcp.f32 %v1868_v39 }
 0x379   :  { %2615 = vrcp.f32 %v1870_v54 }
 0x37a   :  { %v1907_v36 = vsel %vm1843_vm3, %v1876_v55, 0.0  ;;  %2617 = vrcp.f32 %v1872_v57 }
 0x37b   :  { %v1923_v45 = vmul.f32 -1.0, %v1907_v36  ;;  %v1784_v46 = vpop.xlane.xlu1 %1783 }
 0x37c   :  { %v1880_v31 = vmul.f32 %v2592_v49, %v1784_v46 }
 0x37d   :  { %1939 = vst [vmem:[#allocation5] sm:$0xff] %v1923_v45 }
 0x37e   :  { %v1909_v11 = vsel %vm1845_vm0, %v1880_v31, 0.0 }
 0x37f   :  { %v1925_v0 = vmul.f32 -1.0, %v1909_v11  ;;  %v1788_v8 = vpop.xlane.xlu1 %1787 }
 0x380   :  { %v1884_v34 = vmul.f32 %v2594_v61, %v1788_v8 }
 0x381   :  { %1941 = vst [vmem:[#allocation5 + $0x10] sm:$0xff] %v1925_v0 }
 0x382   :  { %v1911_v5 = vsel %vm1847_vm14, %v1884_v34, 0.0 }
 0x383   :  { %v1927_v14 = vmul.f32 -1.0, %v1911_v5  ;;  %v1792_v9 = vpop.xlane.xlu1 %1791  ;;  %v2610_v47 = vpop.eup %2609 }
 0x384   :  { %v1888_v26 = vmul.f32 %v2596_v20, %v1792_v9  ;;  %v2612_v46 = vpop.eup %2611 }
 0x385   :  { %1943 = vst [vmem:[#allocation5 + $0x20] sm:$0xff] %v1927_v14  ;;  %v2614_v33 = vpop.eup %2613 }
 0x386   :  { %v1913_v24 = vsel %vm1849_vm15, %v1888_v26, 0.0  ;;  %v2616_v20 = vpop.eup %2615 }
 0x387   :  { %v1929_v32 = vmul.f32 -1.0, %v1913_v24  ;;  %v1796_v15 = vpop.xlane.xlu1 %1795  ;;  %v2618_v26 = vpop.eup %2617 }
 0x388   :  { %v1892_v41 = vmul.f32 %v2598_v2, %v1796_v15 }
 0x389   :  { %1945 = vst [vmem:[#allocation5 + $0x30] sm:$0xff] %v1929_v32 }
 0x38a   :  { %v1915_v35 = vsel %vm1851_vm6, %v1892_v41, 0.0 }
 0x38b   :  { %v1931_v27 = vmul.f32 -1.0, %v1915_v35  ;;  %v1800_v29 = vpop.xlane.xlu1 %1799 }
 0x38c   :  { %v1896_v63 = vmul.f32 %v2600_v38, %v1800_v29 }
 0x38d   :  { %1947 = vst [vmem:[#allocation5 + $0x40] sm:$0xff] %v1931_v27 }
 0x38e   :  { %v1917_v25 = vsel %vm1853_vm9, %v1896_v63, 0.0 }
 0x38f   :  { %v1933_v7 = vmul.f32 -1.0, %v1917_v25  ;;  %v4036_v10 = vpop.xlane.xlu0 %1841 }
 0x390   :  { %v1874_v22 = vmax.f32 %v4036_v10, 1.0  ;;  %vm1858_vm10 = vcmp.gt.f32.partialorder %v4036_v10, 0.0 }
 0x391   :  { %1949 = vst [vmem:[#allocation5 + $0x50] sm:$0xff] %v1933_v7 }
 0x392   :  { %2619 = vrcp.f32 %v1874_v22 }
 0x393   :  { %v1804_v56 = vpop.xlane.xlu1 %1803  ;;  %v1782_v19 = vpop.xlane.xlu0 %1781 }
 0x394   :  { %v1900_v60 = vmul.f32 %v2604_v59, %v1804_v56  ;;  %v1878_v44 = vmul.f32 %v2602_v6, %v1782_v19 }
 0x396   :  { %v1919_v23 = vsel %vm1855_vm4, %v1900_v60, 0.0  ;;  %v1908_v42 = vsel %vm1844_vm8, %v1878_v44, 0.0 }
 0x397   :  { %v1935_v21 = vmul.f32 -1.0, %v1919_v23  ;;  %v1924_v43 = vmul.f32 -1.0, %v1908_v42  ;;  %v1786_v18 = vpop.xlane.xlu0 %1785 }
 0x398   :  { %v1882_v1 = vmul.f32 %v2606_v17, %v1786_v18 }
 0x399   :  { %1951 = vst [vmem:[#allocation5 + $0x60] sm:$0xff] %v1935_v21  ;;  %1940 = vst [vmem:[#allocation5 + $0x8] sm:$0xff] %v1924_v43 }
 0x39a   :  { %v1910_v62 = vsel %vm1846_vm1, %v1882_v1, 0.0 }
 0x39b   :  { %v1926_v40 = vmul.f32 -1.0, %v1910_v62  ;;  %v1808_v52 = vpop.xlane.xlu1 %1807  ;;  %v1790_v55 = vpop.xlane.xlu0 %1789 }
 0x39c   :  { %v1904_v36 = vmul.f32 %v2610_v47, %v1808_v52  ;;  %v1886_v49 = vmul.f32 %v2608_v13, %v1790_v55 }
 0x39d   :  { %1942 = vst [vmem:[#allocation5 + $0x18] sm:$0xff] %v1926_v40 }
 0x39e   :  { %v1921_v28 = vsel %vm1857_vm5, %v1904_v36, 0.0  ;;  %v1912_v45 = vsel %vm1848_vm11, %v1886_v49, 0.0 }
 0x39f   :  { %v1937_v31 = vmul.f32 -1.0, %v1921_v28  ;;  %v1928_v11 = vmul.f32 -1.0, %v1912_v45  ;;  %v1794_v61 = vpop.xlane.xlu0 %1793  ;;  %v2620_v15 = vpop.eup %2619 }
 0x3a0   :  { %v1890_v0 = vmul.f32 %v2612_v46, %v1794_v61 }
 0x3a1   :  { %1953 = vst [vmem:[#allocation5 + $0x70] sm:$0xff] %v1937_v31  ;;  %1944 = vst [vmem:[#allocation5 + $0x28] sm:$0xff] %v1928_v11 }
 0x3a2   :  { %v1914_v8 = vsel %vm1850_vm13, %v1890_v0, 0.0 }
 0x3a3   :  { %v1930_v34 = vmul.f32 -1.0, %v1914_v8  ;;  %v1798_v12 = vpop.xlane.xlu0 %1797 }
 0x3a4   :  { %v1894_v51 = vmul.f32 %v2614_v33, %v1798_v12 }
 0x3a5   :  { %1946 = vst [vmem:[#allocation5 + $0x38] sm:$0xff] %v1930_v34 }
 0x3a6   :  { %v1916_v5 = vsel %vm1852_vm7, %v1894_v51, 0.0 }
 0x3a7   :  { %v1932_v58 = vmul.f32 -1.0, %v1916_v5  ;;  %v1802_v14 = vpop.xlane.xlu0 %1801 }
 0x3a8   :  { %v1898_v9 = vmul.f32 %v2616_v20, %v1802_v14 }
 0x3a9   :  { %1948 = vst [vmem:[#allocation5 + $0x48] sm:$0xff] %v1932_v58 }
 0x3aa   :  { %v1918_v53 = vsel %vm1854_vm12, %v1898_v9, 0.0 }
 0x3ab   :  { %v1934_v24 = vmul.f32 -1.0, %v1918_v53  ;;  %v1806_v4 = vpop.xlane.xlu0 %1805 }
 0x3ac   :  { %v1902_v32 = vmul.f32 %v2618_v26, %v1806_v4 }
 0x3ad   :  { %1950 = vst [vmem:[#allocation5 + $0x58] sm:$0xff] %v1934_v24 }
 0x3ae   :  { %v1920_v2 = vsel %vm1856_vm2, %v1902_v32, 0.0 }
 0x3af   :  { %v1936_v3 = vmul.f32 -1.0, %v1920_v2  ;;  %v1810_v41 = vpop.xlane.xlu0 %1809 }
 0x3b0   :  { %v1906_v16 = vmul.f32 %v2620_v15, %v1810_v41 }
 0x3b1   :  { %1952 = vst [vmem:[#allocation5 + $0x68] sm:$0xff] %v1936_v3 }
 0x3b2   :  { %v1922_v50 = vsel %vm1858_vm10, %v1906_v16, 0.0 }
 0x3b3   :  { %v1938_v30 = vmul.f32 -1.0, %v1922_v50 }
 0x3b5   :  { %1954 = vst [vmem:[#allocation5 + $0x78] sm:$0xff] %v1938_v30 }
 0x3b6   :  { %2652 = shalt.err (!%p2649_p9)
}
 0x3b7   :  { %1966 = dma.vmem_to_hbm [thread:$0]  %s1961_s8, 2048, %s4062_s4, [#allocation4], %s2666_s18, %s2666_s18, %s2667_s19  }
 0x3b8   :  { %2663 = dma.done.wait [#allocation4], 2048  }
 0x3b9   :  { %2664 = vsyncadd [#allocation4], 4294965248 }
 0x3ba   :  { %1970 = vsyncpa [#allocation3], 1 }
 0x3bb   :  { %1971 = vsyncpa [#allocation4], 1 }

</bundles_post_ra>
